<compile_context>
chip_gen: v7x
topology: tpu7x:2x2x1
jax: 0.10.0
libtpu: 0.0.40
codegen_flags: <defaults>
</compile_context>

<pallas_src>
import math

import jax
import jax.numpy as jnp
from jax.experimental import pallas as pl

# ----------------------------- configuration --------------------------------
STEPS = 2
D_MODEL = 32
NHEAD = 4
HEAD_DIM = D_MODEL // NHEAD
DIM_FF = 64
D_FILLER = 16
NUM_OPS = 8
LAYER_NORM_EPS = 1e-5
LAYERS_PER_STEP = 2
# TODO(synk): 'gumbel' op_dist_fn / arg_dist_fn needs Gumbel noise sampling; only 'softmax' implemented.

B = 2   # batch
S = 8   # sequence length (token 0 = op, token 1 = root filler, tokens 2: = args)


# ----------------------------- helpers ---------------------------------------
def _layer_norm(x, w, b, eps):
    mu = jnp.mean(x, axis=-1, keepdims=True)
    var = jnp.mean(jnp.square(x - mu), axis=-1, keepdims=True)
    return (x - mu) * jax.lax.rsqrt(var + eps) * w + b


def _softmax_lastdim(logits):
    m = jnp.max(logits, axis=-1, keepdims=True)
    e = jnp.exp(logits - m)
    return e * pl.reciprocal(jnp.sum(e, axis=-1, keepdims=True), approx=True)


# --------------------------- fused forward kernel ----------------------------
def fused_forward_kernel(
        x_ref,
        wqkv_ref, bqkv_ref, wo_ref, bo_ref,
        ln1w_ref, ln1b_ref, ln2w_ref, ln2b_ref,
        w1_ref, b1_ref, w2_ref, b2_ref,
        wop_ref, bop_ref, wrf_ref, brf_ref, warg_ref, barg_ref,
        enc_ref, op_ref, rf_ref, arg_ref):
    Bn, Sn, Dn = x_ref.shape
    n_tok = Bn * Sn
    n_layers = wqkv_ref.shape[0]
    hd = Dn // NHEAD
    scale = 1.0 / math.sqrt(hd)

    # whole batch folded to (B*S, D); tile-aligned reshape (Sn == sublane tile).
    x = x_ref[...].astype(jnp.float32).reshape(n_tok, Dn)

    for l in range(n_layers):                       # static unroll over encoder layers
        # ---------------- self-attention ----------------
        qkv = jnp.dot(x, wqkv_ref[l].astype(jnp.float32),
                      preferred_element_type=jnp.float32) + bqkv_ref[l].astype(jnp.float32)
        q = qkv[:, :Dn]
        k = qkv[:, Dn:2 * Dn]
        v = qkv[:, 2 * Dn:]

        wo = wo_ref[l].astype(jnp.float32)          # (D, D) pre-transposed
        attn = jnp.zeros((n_tok, Dn), jnp.float32)
        for h in range(NHEAD):                      # static unroll; batched over B inside
            lo, hi = h * hd, (h + 1) * hd
            qh = q[:, lo:hi].reshape(Bn, Sn, hd)
            kh = k[:, lo:hi].reshape(Bn, Sn, hd)
            vh = v[:, lo:hi].reshape(Bn, Sn, hd)
            s = jnp.einsum('bqd,bkd->bqk', qh, kh,
                           preferred_element_type=jnp.float32) * scale
            p = _softmax_lastdim(s)
            ctx = jnp.einsum('bqk,bkd->bqd', p, vh,
                             preferred_element_type=jnp.float32)
            # per-head slice of the output projection accumulated directly:
            # avoids any lane-axis concatenate of head outputs.
            attn = attn + jnp.dot(ctx.reshape(n_tok, hd), wo[lo:hi, :],
                                  preferred_element_type=jnp.float32)
        attn = attn + bo_ref[l].astype(jnp.float32)

        # -------- post-norm residual blocks (dropout = identity at eval) -------
        x = _layer_norm(x + attn,
                        ln1w_ref[l].astype(jnp.float32),
                        ln1b_ref[l].astype(jnp.float32), LAYER_NORM_EPS)
        h1 = jnp.maximum(
            jnp.dot(x, w1_ref[l].astype(jnp.float32),
                    preferred_element_type=jnp.float32) + b1_ref[l].astype(jnp.float32),
            0.0)                                     # relu activation
        ff = jnp.dot(h1, w2_ref[l].astype(jnp.float32),
                     preferred_element_type=jnp.float32) + b2_ref[l].astype(jnp.float32)
        x = _layer_norm(x + ff,
                        ln2w_ref[l].astype(jnp.float32),
                        ln2b_ref[l].astype(jnp.float32), LAYER_NORM_EPS)

    x3 = x.reshape(Bn, Sn, Dn)
    enc_ref[...] = x3.astype(enc_ref.dtype)

    # ---------------- output heads ----------------
    e_op = x3[:, 0, :]                               # (B, D)
    e_rf = x3[:, 1, :]                               # (B, D)

    # op_dist = softmax(op_logits, dim=-1)
    op_logits = jnp.dot(e_op, wop_ref[...].astype(jnp.float32),
                        preferred_element_type=jnp.float32) + bop_ref[...].astype(jnp.float32)
    op_ref[...] = _softmax_lastdim(op_logits).astype(op_ref.dtype)

    # root_filler = Linear(d_model, d_filler)(enc[:, 1, :])
    rf = jnp.dot(e_rf, wrf_ref[...].astype(jnp.float32),
                 preferred_element_type=jnp.float32) + brf_ref[...].astype(jnp.float32)
    rf_ref[...] = rf.astype(rf_ref.dtype)

    # arg logits on the full (B*S, D) block; slice rows 2: of the tiny result.
    arg_all = jnp.dot(x, warg_ref[...].astype(jnp.float32),
                      preferred_element_type=jnp.float32) + barg_ref[...].astype(jnp.float32)
    arg_logits = arg_all.reshape(Bn, Sn, 4)[:, 2:, :]            # (B, S-2, 4)
    m = jnp.max(arg_logits, axis=1, keepdims=True)               # softmax over seq axis
    e = jnp.exp(arg_logits - m)
    arg_w = e * pl.reciprocal(jnp.sum(e, axis=1, keepdims=True), approx=True)
    arg_ref[...] = arg_w.astype(arg_ref.dtype)


# ------------------------------ host wrapper ---------------------------------
def _cost_estimate(params_step):
    n = B * S
    per_layer = (2 * n * D_MODEL * 3 * D_MODEL               # qkv projection
                 + 2 * 2 * B * NHEAD * S * S * HEAD_DIM      # scores + context
                 + 2 * n * D_MODEL * D_MODEL                 # output projection
                 + 2 * 2 * n * D_MODEL * DIM_FF)             # feed-forward
    flops = (LAYERS_PER_STEP * per_layer
             + 2 * B * D_MODEL * (NUM_OPS + D_FILLER)
             + 2 * n * D_MODEL * 4)
    transcendentals = (LAYERS_PER_STEP * B * NHEAD * S * S
                       + B * NUM_OPS + B * (S - 2) * 4)
    io_elems = (B * S * D_MODEL * 2 + B * NUM_OPS + B * D_FILLER + B * (S - 2) * 4
                + sum(int(p.size) for p in params_step))
    return pl.CostEstimate(flops=flops, transcendentals=transcendentals,
                           bytes_accessed=4 * io_elems)


def neural_tree_agent_forward(encodings, step, params):
    p = params[step]
    Bn, Sn, _ = encodings.shape
    out_shape = (
        jax.ShapeDtypeStruct(encodings.shape, encodings.dtype),          # enc
        jax.ShapeDtypeStruct((Bn, NUM_OPS), encodings.dtype),            # op_dist
        jax.ShapeDtypeStruct((Bn, D_FILLER), encodings.dtype),           # root_filler
        jax.ShapeDtypeStruct((Bn, Sn - 2, 4), encodings.dtype),          # arg_weights
    )
    enc, op_dist, root_filler, arg_weights = pl.pallas_call(
        fused_forward_kernel,
        out_shape=out_shape,
        cost_estimate=_cost_estimate(p),
    )(encodings, *p)
    return op_dist, root_filler, arg_weights, enc


# ----------------------------- parameter init --------------------------------
def init_params(key):
    # Weights are stored PRE-TRANSPOSED: (in_features, out_features).
    def lin_t(k, in_f, out_f):
        k1, k2 = jax.random.split(k)
        bound = 1.0 / math.sqrt(in_f)
        w = jax.random.uniform(k1, (in_f, out_f), jnp.float32, -bound, bound)
        b = jax.random.uniform(k2, (1, out_f), jnp.float32, -bound, bound)
        return w, b

    names = ("wqkv", "bqkv", "wo", "bo", "ln1w", "ln1b", "ln2w", "ln2b",
             "w1", "b1", "w2", "b2")
    params = []
    step_keys = jax.random.split(key, STEPS)
    for s in range(STEPS):
        ks = jax.random.split(step_keys[s], LAYERS_PER_STEP + 3)
        per_layer = {n: [] for n in names}
        for l in range(LAYERS_PER_STEP):
            kl = jax.random.split(ks[l], 4)
            wqkv, bqkv = lin_t(kl[0], D_MODEL, 3 * D_MODEL)
            wo, bo = lin_t(kl[1], D_MODEL, D_MODEL)
            w1, b1 = lin_t(kl[2], D_MODEL, DIM_FF)
            w2, b2 = lin_t(kl[3], DIM_FF, D_MODEL)
            vals = dict(wqkv=wqkv, bqkv=bqkv, wo=wo, bo=bo,
                        ln1w=jnp.ones((1, D_MODEL), jnp.float32),
                        ln1b=jnp.zeros((1, D_MODEL), jnp.float32),
                        ln2w=jnp.ones((1, D_MODEL), jnp.float32),
                        ln2b=jnp.zeros((1, D_MODEL), jnp.float32),
                        w1=w1, b1=b1, w2=w2, b2=b2)
            for n in names:
                per_layer[n].append(vals[n])
        stacked = {n: jnp.stack(per_layer[n], axis=0) for n in names}  # (L, ...)
        wop, bop = lin_t(ks[LAYERS_PER_STEP + 0], D_MODEL, NUM_OPS)
        wrf, brf = lin_t(ks[LAYERS_PER_STEP + 1], D_MODEL, D_FILLER)
        warg, barg = lin_t(ks[LAYERS_PER_STEP + 2], D_MODEL, 4)
        params.append((stacked["wqkv"], stacked["bqkv"], stacked["wo"], stacked["bo"],
                       stacked["ln1w"], stacked["ln1b"], stacked["ln2w"], stacked["ln2b"],
                       stacked["w1"], stacked["b1"], stacked["w2"], stacked["b2"],
                       wop, bop, wrf, brf, warg, barg))
    return params


# --------------------------------- main ---------------------------------------
if __name__ == "__main__":
    key = jax.random.PRNGKey(0)
    kx, kp = jax.random.split(key)
    params = init_params(kp)
    encodings = jax.random.normal(kx, (B, S, D_MODEL), dtype=jnp.float32)

    out = neural_tree_agent_forward(encodings, 0, params)
    jax.block_until_ready(out)

    op_dist, root_filler, arg_weights, enc = out
    assert op_dist.shape == (B, NUM_OPS)
    assert root_filler.shape == (B, D_FILLER)
    assert arg_weights.shape == (B, S - 2, 4)
    assert enc.shape == (B, S, D_MODEL)
    print("KERNEL_OK")
</pallas_src>

<mosaic_0001>
module attributes {stable_mosaic.version = 11 : i64} {
  func.func @fused_forward_kernel(%arg0: memref<2x8x32xf32, #tpu.memory_space<vmem>>, %arg1: memref<2x32x96xf32, #tpu.memory_space<vmem>>, %arg2: memref<2x1x96xf32, #tpu.memory_space<vmem>>, %arg3: memref<2x32x32xf32, #tpu.memory_space<vmem>>, %arg4: memref<2x1x32xf32, #tpu.memory_space<vmem>>, %arg5: memref<2x1x32xf32, #tpu.memory_space<vmem>>, %arg6: memref<2x1x32xf32, #tpu.memory_space<vmem>>, %arg7: memref<2x1x32xf32, #tpu.memory_space<vmem>>, %arg8: memref<2x1x32xf32, #tpu.memory_space<vmem>>, %arg9: memref<2x32x64xf32, #tpu.memory_space<vmem>>, %arg10: memref<2x1x64xf32, #tpu.memory_space<vmem>>, %arg11: memref<2x64x32xf32, #tpu.memory_space<vmem>>, %arg12: memref<2x1x32xf32, #tpu.memory_space<vmem>>, %arg13: memref<32x8xf32, #tpu.memory_space<vmem>>, %arg14: memref<1x8xf32, #tpu.memory_space<vmem>>, %arg15: memref<32x16xf32, #tpu.memory_space<vmem>>, %arg16: memref<1x16xf32, #tpu.memory_space<vmem>>, %arg17: memref<32x4xf32, #tpu.memory_space<vmem>>, %arg18: memref<1x4xf32, #tpu.memory_space<vmem>>, %arg19: memref<2x8x32xf32, #tpu.memory_space<vmem>>, %arg20: memref<2x8xf32, #tpu.memory_space<vmem>>, %arg21: memref<2x16xf32, #tpu.memory_space<vmem>>, %arg22: memref<2x6x4xf32, #tpu.memory_space<vmem>>) attributes {dimension_semantics = [], scalar_prefetch = 0 : i64, scratch_operands = 0 : i64, tpu.core_type = #tpu.core_type<tc>} {
    %c0 = arith.constant 0 : index
    %c0_0 = arith.constant 0 : index
    %c0_1 = arith.constant 0 : index
    %0 = vector.load %arg0[%c0, %c0_0, %c0_1] : memref<2x8x32xf32, #tpu.memory_space<vmem>>, vector<2x8x32xf32>
    %1 = vector.shape_cast %0 : vector<2x8x32xf32> to vector<16x32xf32>
    %c0_2 = arith.constant 0 : index
    %c0_3 = arith.constant 0 : index
    %c0_4 = arith.constant 0 : index
    %2 = vector.load %arg1[%c0_2, %c0_3, %c0_4] : memref<2x32x96xf32, #tpu.memory_space<vmem>>, vector<1x32x96xf32>
    %3 = vector.shape_cast %2 : vector<1x32x96xf32> to vector<32x96xf32>
    %cst = arith.constant dense<0.000000e+00> : vector<16x96xf32>
    %4 = tpu.matmul %1, %3, %cst {dimension_numbers = #tpu.dot_dimension_numbers<[1], [0], [0], [1], [0, 0, 1, 1], [], []>} : vector<16x32xf32>, vector<32x96xf32>, vector<16x96xf32> -> vector<16x96xf32>
    %c0_5 = arith.constant 0 : index
    %c0_6 = arith.constant 0 : index
    %c0_7 = arith.constant 0 : index
    %5 = vector.load %arg2[%c0_5, %c0_6, %c0_7] : memref<2x1x96xf32, #tpu.memory_space<vmem>>, vector<1x1x96xf32>
    %6 = vector.shape_cast %5 : vector<1x1x96xf32> to vector<1x96xf32>
    %7 = vector.broadcast %6 : vector<1x96xf32> to vector<16x96xf32>
    %8 = arith.addf %4, %7 : vector<16x96xf32>
    %9 = vector.extract_strided_slice %8 {offsets = [0, 0], sizes = [16, 32], strides = [1, 1]} : vector<16x96xf32> to vector<16x32xf32>
    %10 = vector.extract_strided_slice %8 {offsets = [0, 32], sizes = [16, 32], strides = [1, 1]} : vector<16x96xf32> to vector<16x32xf32>
    %11 = vector.extract_strided_slice %8 {offsets = [0, 64], sizes = [16, 32], strides = [1, 1]} : vector<16x96xf32> to vector<16x32xf32>
    %c0_8 = arith.constant 0 : index
    %c0_9 = arith.constant 0 : index
    %c0_10 = arith.constant 0 : index
    %12 = vector.load %arg3[%c0_8, %c0_9, %c0_10] : memref<2x32x32xf32, #tpu.memory_space<vmem>>, vector<1x32x32xf32>
    %13 = vector.shape_cast %12 : vector<1x32x32xf32> to vector<32x32xf32>
    %cst_11 = arith.constant 0.000000e+00 : f32
    %14 = vector.broadcast %cst_11 : f32 to vector<16x32xf32>
    %15 = vector.extract_strided_slice %9 {offsets = [0, 0], sizes = [16, 8], strides = [1, 1]} : vector<16x32xf32> to vector<16x8xf32>
    %16 = vector.shape_cast %15 : vector<16x8xf32> to vector<2x8x8xf32>
    %17 = vector.extract_strided_slice %10 {offsets = [0, 0], sizes = [16, 8], strides = [1, 1]} : vector<16x32xf32> to vector<16x8xf32>
    %18 = vector.shape_cast %17 : vector<16x8xf32> to vector<2x8x8xf32>
    %19 = vector.extract_strided_slice %11 {offsets = [0, 0], sizes = [16, 8], strides = [1, 1]} : vector<16x32xf32> to vector<16x8xf32>
    %20 = vector.shape_cast %19 : vector<16x8xf32> to vector<2x8x8xf32>
    "tpu.trace_start"() <{level = 10 : i32, message = "bqd,bkd->bqk"}> : () -> ()
    %cst_12 = arith.constant dense<0.000000e+00> : vector<2x8x8xf32>
    %21 = tpu.matmul %16, %18, %cst_12 {dimension_numbers = #tpu.dot_dimension_numbers<[2], [2], [1], [1], [0, 0, 0, 1, 1, 1], [0], [0]>} : vector<2x8x8xf32>, vector<2x8x8xf32>, vector<2x8x8xf32> -> vector<2x8x8xf32>
    "tpu.trace_stop"() : () -> ()
    %cst_13 = arith.constant 0.353553385 : f32
    %22 = vector.broadcast %cst_13 : f32 to vector<2x8x8xf32>
    %23 = arith.mulf %21, %22 : vector<2x8x8xf32>
    %cst_14 = arith.constant dense<0xFF800000> : vector<2x8xf32>
    %24 = vector.multi_reduction <maximumf>, %23, %cst_14 [2] : vector<2x8x8xf32> to vector<2x8xf32>
    %25 = vector.shape_cast %24 : vector<2x8xf32> to vector<2x8x1xf32>
    %26 = vector.broadcast %25 : vector<2x8x1xf32> to vector<2x8x8xf32>
    %27 = arith.subf %23, %26 : vector<2x8x8xf32>
    %28 = math.exp %27 : vector<2x8x8xf32>
    %cst_15 = arith.constant dense<0.000000e+00> : vector<2x8xf32>
    %29 = vector.multi_reduction <add>, %28, %cst_15 [2] : vector<2x8x8xf32> to vector<2x8xf32>
    %30 = vector.shape_cast %29 : vector<2x8xf32> to vector<2x8x1xf32>
    %31 = tpu.reciprocal %30 {approx = true} : vector<2x8x1xf32> -> vector<2x8x1xf32>
    %32 = vector.broadcast %31 : vector<2x8x1xf32> to vector<2x8x8xf32>
    %33 = arith.mulf %28, %32 : vector<2x8x8xf32>
    "tpu.trace_start"() <{level = 10 : i32, message = "bqk,bkd->bqd"}> : () -> ()
    %cst_16 = arith.constant dense<0.000000e+00> : vector<2x8x8xf32>
    %34 = tpu.matmul %33, %20, %cst_16 {dimension_numbers = #tpu.dot_dimension_numbers<[2], [1], [1], [2], [0, 0, 0, 1, 1, 2], [0], [0]>} : vector<2x8x8xf32>, vector<2x8x8xf32>, vector<2x8x8xf32> -> vector<2x8x8xf32>
    "tpu.trace_stop"() : () -> ()
    %35 = vector.shape_cast %34 : vector<2x8x8xf32> to vector<16x8xf32>
    %36 = vector.extract_strided_slice %13 {offsets = [0, 0], sizes = [8, 32], strides = [1, 1]} : vector<32x32xf32> to vector<8x32xf32>
    %cst_17 = arith.constant dense<0.000000e+00> : vector<16x32xf32>
    %37 = tpu.matmul %35, %36, %cst_17 {dimension_numbers = #tpu.dot_dimension_numbers<[1], [0], [0], [1], [0, 0, 1, 1], [], []>} : vector<16x8xf32>, vector<8x32xf32>, vector<16x32xf32> -> vector<16x32xf32>
    %38 = arith.addf %14, %37 : vector<16x32xf32>
    %39 = vector.extract_strided_slice %9 {offsets = [0, 8], sizes = [16, 8], strides = [1, 1]} : vector<16x32xf32> to vector<16x8xf32>
    %40 = vector.shape_cast %39 : vector<16x8xf32> to vector<2x8x8xf32>
    %41 = vector.extract_strided_slice %10 {offsets = [0, 8], sizes = [16, 8], strides = [1, 1]} : vector<16x32xf32> to vector<16x8xf32>
    %42 = vector.shape_cast %41 : vector<16x8xf32> to vector<2x8x8xf32>
    %43 = vector.extract_strided_slice %11 {offsets = [0, 8], sizes = [16, 8], strides = [1, 1]} : vector<16x32xf32> to vector<16x8xf32>
    %44 = vector.shape_cast %43 : vector<16x8xf32> to vector<2x8x8xf32>
    "tpu.trace_start"() <{level = 10 : i32, message = "bqd,bkd->bqk"}> : () -> ()
    %cst_18 = arith.constant dense<0.000000e+00> : vector<2x8x8xf32>
    %45 = tpu.matmul %40, %42, %cst_18 {dimension_numbers = #tpu.dot_dimension_numbers<[2], [2], [1], [1], [0, 0, 0, 1, 1, 1], [0], [0]>} : vector<2x8x8xf32>, vector<2x8x8xf32>, vector<2x8x8xf32> -> vector<2x8x8xf32>
    "tpu.trace_stop"() : () -> ()
    %cst_19 = arith.constant 0.353553385 : f32
    %46 = vector.broadcast %cst_19 : f32 to vector<2x8x8xf32>
    %47 = arith.mulf %45, %46 : vector<2x8x8xf32>
    %cst_20 = arith.constant dense<0xFF800000> : vector<2x8xf32>
    %48 = vector.multi_reduction <maximumf>, %47, %cst_20 [2] : vector<2x8x8xf32> to vector<2x8xf32>
    %49 = vector.shape_cast %48 : vector<2x8xf32> to vector<2x8x1xf32>
    %50 = vector.broadcast %49 : vector<2x8x1xf32> to vector<2x8x8xf32>
    %51 = arith.subf %47, %50 : vector<2x8x8xf32>
    %52 = math.exp %51 : vector<2x8x8xf32>
    %cst_21 = arith.constant dense<0.000000e+00> : vector<2x8xf32>
    %53 = vector.multi_reduction <add>, %52, %cst_21 [2] : vector<2x8x8xf32> to vector<2x8xf32>
    %54 = vector.shape_cast %53 : vector<2x8xf32> to vector<2x8x1xf32>
    %55 = tpu.reciprocal %54 {approx = true} : vector<2x8x1xf32> -> vector<2x8x1xf32>
    %56 = vector.broadcast %55 : vector<2x8x1xf32> to vector<2x8x8xf32>
    %57 = arith.mulf %52, %56 : vector<2x8x8xf32>
    "tpu.trace_start"() <{level = 10 : i32, message = "bqk,bkd->bqd"}> : () -> ()
    %cst_22 = arith.constant dense<0.000000e+00> : vector<2x8x8xf32>
    %58 = tpu.matmul %57, %44, %cst_22 {dimension_numbers = #tpu.dot_dimension_numbers<[2], [1], [1], [2], [0, 0, 0, 1, 1, 2], [0], [0]>} : vector<2x8x8xf32>, vector<2x8x8xf32>, vector<2x8x8xf32> -> vector<2x8x8xf32>
    "tpu.trace_stop"() : () -> ()
    %59 = vector.shape_cast %58 : vector<2x8x8xf32> to vector<16x8xf32>
    %60 = vector.extract_strided_slice %13 {offsets = [8, 0], sizes = [8, 32], strides = [1, 1]} : vector<32x32xf32> to vector<8x32xf32>
    %cst_23 = arith.constant dense<0.000000e+00> : vector<16x32xf32>
    %61 = tpu.matmul %59, %60, %cst_23 {dimension_numbers = #tpu.dot_dimension_numbers<[1], [0], [0], [1], [0, 0, 1, 1], [], []>} : vector<16x8xf32>, vector<8x32xf32>, vector<16x32xf32> -> vector<16x32xf32>
    %62 = arith.addf %38, %61 : vector<16x32xf32>
    %63 = vector.extract_strided_slice %9 {offsets = [0, 16], sizes = [16, 8], strides = [1, 1]} : vector<16x32xf32> to vector<16x8xf32>
    %64 = vector.shape_cast %63 : vector<16x8xf32> to vector<2x8x8xf32>
    %65 = vector.extract_strided_slice %10 {offsets = [0, 16], sizes = [16, 8], strides = [1, 1]} : vector<16x32xf32> to vector<16x8xf32>
    %66 = vector.shape_cast %65 : vector<16x8xf32> to vector<2x8x8xf32>
    %67 = vector.extract_strided_slice %11 {offsets = [0, 16], sizes = [16, 8], strides = [1, 1]} : vector<16x32xf32> to vector<16x8xf32>
    %68 = vector.shape_cast %67 : vector<16x8xf32> to vector<2x8x8xf32>
    "tpu.trace_start"() <{level = 10 : i32, message = "bqd,bkd->bqk"}> : () -> ()
    %cst_24 = arith.constant dense<0.000000e+00> : vector<2x8x8xf32>
    %69 = tpu.matmul %64, %66, %cst_24 {dimension_numbers = #tpu.dot_dimension_numbers<[2], [2], [1], [1], [0, 0, 0, 1, 1, 1], [0], [0]>} : vector<2x8x8xf32>, vector<2x8x8xf32>, vector<2x8x8xf32> -> vector<2x8x8xf32>
    "tpu.trace_stop"() : () -> ()
    %cst_25 = arith.constant 0.353553385 : f32
    %70 = vector.broadcast %cst_25 : f32 to vector<2x8x8xf32>
    %71 = arith.mulf %69, %70 : vector<2x8x8xf32>
    %cst_26 = arith.constant dense<0xFF800000> : vector<2x8xf32>
    %72 = vector.multi_reduction <maximumf>, %71, %cst_26 [2] : vector<2x8x8xf32> to vector<2x8xf32>
    %73 = vector.shape_cast %72 : vector<2x8xf32> to vector<2x8x1xf32>
    %74 = vector.broadcast %73 : vector<2x8x1xf32> to vector<2x8x8xf32>
    %75 = arith.subf %71, %74 : vector<2x8x8xf32>
    %76 = math.exp %75 : vector<2x8x8xf32>
    %cst_27 = arith.constant dense<0.000000e+00> : vector<2x8xf32>
    %77 = vector.multi_reduction <add>, %76, %cst_27 [2] : vector<2x8x8xf32> to vector<2x8xf32>
    %78 = vector.shape_cast %77 : vector<2x8xf32> to vector<2x8x1xf32>
    %79 = tpu.reciprocal %78 {approx = true} : vector<2x8x1xf32> -> vector<2x8x1xf32>
    %80 = vector.broadcast %79 : vector<2x8x1xf32> to vector<2x8x8xf32>
    %81 = arith.mulf %76, %80 : vector<2x8x8xf32>
    "tpu.trace_start"() <{level = 10 : i32, message = "bqk,bkd->bqd"}> : () -> ()
    %cst_28 = arith.constant dense<0.000000e+00> : vector<2x8x8xf32>
    %82 = tpu.matmul %81, %68, %cst_28 {dimension_numbers = #tpu.dot_dimension_numbers<[2], [1], [1], [2], [0, 0, 0, 1, 1, 2], [0], [0]>} : vector<2x8x8xf32>, vector<2x8x8xf32>, vector<2x8x8xf32> -> vector<2x8x8xf32>
    "tpu.trace_stop"() : () -> ()
    %83 = vector.shape_cast %82 : vector<2x8x8xf32> to vector<16x8xf32>
    %84 = vector.extract_strided_slice %13 {offsets = [16, 0], sizes = [8, 32], strides = [1, 1]} : vector<32x32xf32> to vector<8x32xf32>
    %cst_29 = arith.constant dense<0.000000e+00> : vector<16x32xf32>
    %85 = tpu.matmul %83, %84, %cst_29 {dimension_numbers = #tpu.dot_dimension_numbers<[1], [0], [0], [1], [0, 0, 1, 1], [], []>} : vector<16x8xf32>, vector<8x32xf32>, vector<16x32xf32> -> vector<16x32xf32>
    %86 = arith.addf %62, %85 : vector<16x32xf32>
    %87 = vector.extract_strided_slice %9 {offsets = [0, 24], sizes = [16, 8], strides = [1, 1]} : vector<16x32xf32> to vector<16x8xf32>
    %88 = vector.shape_cast %87 : vector<16x8xf32> to vector<2x8x8xf32>
    %89 = vector.extract_strided_slice %10 {offsets = [0, 24], sizes = [16, 8], strides = [1, 1]} : vector<16x32xf32> to vector<16x8xf32>
    %90 = vector.shape_cast %89 : vector<16x8xf32> to vector<2x8x8xf32>
    %91 = vector.extract_strided_slice %11 {offsets = [0, 24], sizes = [16, 8], strides = [1, 1]} : vector<16x32xf32> to vector<16x8xf32>
    %92 = vector.shape_cast %91 : vector<16x8xf32> to vector<2x8x8xf32>
    "tpu.trace_start"() <{level = 10 : i32, message = "bqd,bkd->bqk"}> : () -> ()
    %cst_30 = arith.constant dense<0.000000e+00> : vector<2x8x8xf32>
    %93 = tpu.matmul %88, %90, %cst_30 {dimension_numbers = #tpu.dot_dimension_numbers<[2], [2], [1], [1], [0, 0, 0, 1, 1, 1], [0], [0]>} : vector<2x8x8xf32>, vector<2x8x8xf32>, vector<2x8x8xf32> -> vector<2x8x8xf32>
    "tpu.trace_stop"() : () -> ()
    %cst_31 = arith.constant 0.353553385 : f32
    %94 = vector.broadcast %cst_31 : f32 to vector<2x8x8xf32>
    %95 = arith.mulf %93, %94 : vector<2x8x8xf32>
    %cst_32 = arith.constant dense<0xFF800000> : vector<2x8xf32>
    %96 = vector.multi_reduction <maximumf>, %95, %cst_32 [2] : vector<2x8x8xf32> to vector<2x8xf32>
    %97 = vector.shape_cast %96 : vector<2x8xf32> to vector<2x8x1xf32>
    %98 = vector.broadcast %97 : vector<2x8x1xf32> to vector<2x8x8xf32>
    %99 = arith.subf %95, %98 : vector<2x8x8xf32>
    %100 = math.exp %99 : vector<2x8x8xf32>
    %cst_33 = arith.constant dense<0.000000e+00> : vector<2x8xf32>
    %101 = vector.multi_reduction <add>, %100, %cst_33 [2] : vector<2x8x8xf32> to vector<2x8xf32>
    %102 = vector.shape_cast %101 : vector<2x8xf32> to vector<2x8x1xf32>
    %103 = tpu.reciprocal %102 {approx = true} : vector<2x8x1xf32> -> vector<2x8x1xf32>
    %104 = vector.broadcast %103 : vector<2x8x1xf32> to vector<2x8x8xf32>
    %105 = arith.mulf %100, %104 : vector<2x8x8xf32>
    "tpu.trace_start"() <{level = 10 : i32, message = "bqk,bkd->bqd"}> : () -> ()
    %cst_34 = arith.constant dense<0.000000e+00> : vector<2x8x8xf32>
    %106 = tpu.matmul %105, %92, %cst_34 {dimension_numbers = #tpu.dot_dimension_numbers<[2], [1], [1], [2], [0, 0, 0, 1, 1, 2], [0], [0]>} : vector<2x8x8xf32>, vector<2x8x8xf32>, vector<2x8x8xf32> -> vector<2x8x8xf32>
    "tpu.trace_stop"() : () -> ()
    %107 = vector.shape_cast %106 : vector<2x8x8xf32> to vector<16x8xf32>
    %108 = vector.extract_strided_slice %13 {offsets = [24, 0], sizes = [8, 32], strides = [1, 1]} : vector<32x32xf32> to vector<8x32xf32>
    %cst_35 = arith.constant dense<0.000000e+00> : vector<16x32xf32>
    %109 = tpu.matmul %107, %108, %cst_35 {dimension_numbers = #tpu.dot_dimension_numbers<[1], [0], [0], [1], [0, 0, 1, 1], [], []>} : vector<16x8xf32>, vector<8x32xf32>, vector<16x32xf32> -> vector<16x32xf32>
    %110 = arith.addf %86, %109 : vector<16x32xf32>
    %c0_36 = arith.constant 0 : index
    %c0_37 = arith.constant 0 : index
    %c0_38 = arith.constant 0 : index
    %111 = vector.load %arg4[%c0_36, %c0_37, %c0_38] : memref<2x1x32xf32, #tpu.memory_space<vmem>>, vector<1x1x32xf32>
    %112 = vector.shape_cast %111 : vector<1x1x32xf32> to vector<1x32xf32>
    %113 = vector.broadcast %112 : vector<1x32xf32> to vector<16x32xf32>
    %114 = arith.addf %110, %113 : vector<16x32xf32>
    %115 = arith.addf %1, %114 : vector<16x32xf32>
    %c0_39 = arith.constant 0 : index
    %c0_40 = arith.constant 0 : index
    %c0_41 = arith.constant 0 : index
    %116 = vector.load %arg5[%c0_39, %c0_40, %c0_41] : memref<2x1x32xf32, #tpu.memory_space<vmem>>, vector<1x1x32xf32>
    %117 = vector.shape_cast %116 : vector<1x1x32xf32> to vector<1x32xf32>
    %c0_42 = arith.constant 0 : index
    %c0_43 = arith.constant 0 : index
    %c0_44 = arith.constant 0 : index
    %118 = vector.load %arg6[%c0_42, %c0_43, %c0_44] : memref<2x1x32xf32, #tpu.memory_space<vmem>>, vector<1x1x32xf32>
    %119 = vector.shape_cast %118 : vector<1x1x32xf32> to vector<1x32xf32>
    %cst_45 = arith.constant dense<0.000000e+00> : vector<16xf32>
    %120 = vector.multi_reduction <add>, %115, %cst_45 [1] : vector<16x32xf32> to vector<16xf32>
    %121 = vector.shape_cast %120 : vector<16xf32> to vector<16x1xf32>
    %cst_46 = arith.constant 3.200000e+01 : f32
    %122 = vector.broadcast %cst_46 : f32 to vector<16x1xf32>
    %123 = arith.divf %121, %122 : vector<16x1xf32>
    %124 = vector.broadcast %123 : vector<16x1xf32> to vector<16x32xf32>
    %125 = arith.subf %115, %124 : vector<16x32xf32>
    %126 = arith.mulf %125, %125 : vector<16x32xf32>
    %cst_47 = arith.constant dense<0.000000e+00> : vector<16xf32>
    %127 = vector.multi_reduction <add>, %126, %cst_47 [1] : vector<16x32xf32> to vector<16xf32>
    %128 = vector.shape_cast %127 : vector<16xf32> to vector<16x1xf32>
    %cst_48 = arith.constant 3.200000e+01 : f32
    %129 = vector.broadcast %cst_48 : f32 to vector<16x1xf32>
    %130 = arith.divf %128, %129 : vector<16x1xf32>
    %131 = vector.broadcast %123 : vector<16x1xf32> to vector<16x32xf32>
    %132 = arith.subf %115, %131 : vector<16x32xf32>
    %cst_49 = arith.constant 9.99999974E-6 : f32
    %133 = vector.broadcast %cst_49 : f32 to vector<16x1xf32>
    %134 = arith.addf %130, %133 : vector<16x1xf32>
    %135 = math.rsqrt %134 : vector<16x1xf32>
    %136 = vector.broadcast %135 : vector<16x1xf32> to vector<16x32xf32>
    %137 = arith.mulf %132, %136 : vector<16x32xf32>
    %138 = vector.broadcast %117 : vector<1x32xf32> to vector<16x32xf32>
    %139 = arith.mulf %137, %138 : vector<16x32xf32>
    %140 = vector.broadcast %119 : vector<1x32xf32> to vector<16x32xf32>
    %141 = arith.addf %139, %140 : vector<16x32xf32>
    %c0_50 = arith.constant 0 : index
    %c0_51 = arith.constant 0 : index
    %c0_52 = arith.constant 0 : index
    %142 = vector.load %arg9[%c0_50, %c0_51, %c0_52] : memref<2x32x64xf32, #tpu.memory_space<vmem>>, vector<1x32x64xf32>
    %143 = vector.shape_cast %142 : vector<1x32x64xf32> to vector<32x64xf32>
    %cst_53 = arith.constant dense<0.000000e+00> : vector<16x64xf32>
    %144 = tpu.matmul %141, %143, %cst_53 {dimension_numbers = #tpu.dot_dimension_numbers<[1], [0], [0], [1], [0, 0, 1, 1], [], []>} : vector<16x32xf32>, vector<32x64xf32>, vector<16x64xf32> -> vector<16x64xf32>
    %c0_54 = arith.constant 0 : index
    %c0_55 = arith.constant 0 : index
    %c0_56 = arith.constant 0 : index
    %145 = vector.load %arg10[%c0_54, %c0_55, %c0_56] : memref<2x1x64xf32, #tpu.memory_space<vmem>>, vector<1x1x64xf32>
    %146 = vector.shape_cast %145 : vector<1x1x64xf32> to vector<1x64xf32>
    %147 = vector.broadcast %146 : vector<1x64xf32> to vector<16x64xf32>
    %148 = arith.addf %144, %147 : vector<16x64xf32>
    %cst_57 = arith.constant 0.000000e+00 : f32
    %149 = vector.broadcast %cst_57 : f32 to vector<16x64xf32>
    %150 = arith.maximumf %148, %149 : vector<16x64xf32>
    %c0_58 = arith.constant 0 : index
    %c0_59 = arith.constant 0 : index
    %c0_60 = arith.constant 0 : index
    %151 = vector.load %arg11[%c0_58, %c0_59, %c0_60] : memref<2x64x32xf32, #tpu.memory_space<vmem>>, vector<1x64x32xf32>
    %152 = vector.shape_cast %151 : vector<1x64x32xf32> to vector<64x32xf32>
    %cst_61 = arith.constant dense<0.000000e+00> : vector<16x32xf32>
    %153 = tpu.matmul %150, %152, %cst_61 {dimension_numbers = #tpu.dot_dimension_numbers<[1], [0], [0], [1], [0, 0, 1, 1], [], []>} : vector<16x64xf32>, vector<64x32xf32>, vector<16x32xf32> -> vector<16x32xf32>
    %c0_62 = arith.constant 0 : index
    %c0_63 = arith.constant 0 : index
    %c0_64 = arith.constant 0 : index
    %154 = vector.load %arg12[%c0_62, %c0_63, %c0_64] : memref<2x1x32xf32, #tpu.memory_space<vmem>>, vector<1x1x32xf32>
    %155 = vector.shape_cast %154 : vector<1x1x32xf32> to vector<1x32xf32>
    %156 = vector.broadcast %155 : vector<1x32xf32> to vector<16x32xf32>
    %157 = arith.addf %153, %156 : vector<16x32xf32>
    %158 = arith.addf %141, %157 : vector<16x32xf32>
    %c0_65 = arith.constant 0 : index
    %c0_66 = arith.constant 0 : index
    %c0_67 = arith.constant 0 : index
    %159 = vector.load %arg7[%c0_65, %c0_66, %c0_67] : memref<2x1x32xf32, #tpu.memory_space<vmem>>, vector<1x1x32xf32>
    %160 = vector.shape_cast %159 : vector<1x1x32xf32> to vector<1x32xf32>
    %c0_68 = arith.constant 0 : index
    %c0_69 = arith.constant 0 : index
    %c0_70 = arith.constant 0 : index
    %161 = vector.load %arg8[%c0_68, %c0_69, %c0_70] : memref<2x1x32xf32, #tpu.memory_space<vmem>>, vector<1x1x32xf32>
    %162 = vector.shape_cast %161 : vector<1x1x32xf32> to vector<1x32xf32>
    %cst_71 = arith.constant dense<0.000000e+00> : vector<16xf32>
    %163 = vector.multi_reduction <add>, %158, %cst_71 [1] : vector<16x32xf32> to vector<16xf32>
    %164 = vector.shape_cast %163 : vector<16xf32> to vector<16x1xf32>
    %cst_72 = arith.constant 3.200000e+01 : f32
    %165 = vector.broadcast %cst_72 : f32 to vector<16x1xf32>
    %166 = arith.divf %164, %165 : vector<16x1xf32>
    %167 = vector.broadcast %166 : vector<16x1xf32> to vector<16x32xf32>
    %168 = arith.subf %158, %167 : vector<16x32xf32>
    %169 = arith.mulf %168, %168 : vector<16x32xf32>
    %cst_73 = arith.constant dense<0.000000e+00> : vector<16xf32>
    %170 = vector.multi_reduction <add>, %169, %cst_73 [1] : vector<16x32xf32> to vector<16xf32>
    %171 = vector.shape_cast %170 : vector<16xf32> to vector<16x1xf32>
    %cst_74 = arith.constant 3.200000e+01 : f32
    %172 = vector.broadcast %cst_74 : f32 to vector<16x1xf32>
    %173 = arith.divf %171, %172 : vector<16x1xf32>
    %174 = vector.broadcast %166 : vector<16x1xf32> to vector<16x32xf32>
    %175 = arith.subf %158, %174 : vector<16x32xf32>
    %cst_75 = arith.constant 9.99999974E-6 : f32
    %176 = vector.broadcast %cst_75 : f32 to vector<16x1xf32>
    %177 = arith.addf %173, %176 : vector<16x1xf32>
    %178 = math.rsqrt %177 : vector<16x1xf32>
    %179 = vector.broadcast %178 : vector<16x1xf32> to vector<16x32xf32>
    %180 = arith.mulf %175, %179 : vector<16x32xf32>
    %181 = vector.broadcast %160 : vector<1x32xf32> to vector<16x32xf32>
    %182 = arith.mulf %180, %181 : vector<16x32xf32>
    %183 = vector.broadcast %162 : vector<1x32xf32> to vector<16x32xf32>
    %184 = arith.addf %182, %183 : vector<16x32xf32>
    %c1 = arith.constant 1 : index
    %c0_76 = arith.constant 0 : index
    %c0_77 = arith.constant 0 : index
    %185 = vector.load %arg1[%c1, %c0_76, %c0_77] : memref<2x32x96xf32, #tpu.memory_space<vmem>>, vector<1x32x96xf32>
    %186 = vector.shape_cast %185 : vector<1x32x96xf32> to vector<32x96xf32>
    %cst_78 = arith.constant dense<0.000000e+00> : vector<16x96xf32>
    %187 = tpu.matmul %184, %186, %cst_78 {dimension_numbers = #tpu.dot_dimension_numbers<[1], [0], [0], [1], [0, 0, 1, 1], [], []>} : vector<16x32xf32>, vector<32x96xf32>, vector<16x96xf32> -> vector<16x96xf32>
    %c1_79 = arith.constant 1 : index
    %c0_80 = arith.constant 0 : index
    %c0_81 = arith.constant 0 : index
    %188 = vector.load %arg2[%c1_79, %c0_80, %c0_81] : memref<2x1x96xf32, #tpu.memory_space<vmem>>, vector<1x1x96xf32>
    %189 = vector.shape_cast %188 : vector<1x1x96xf32> to vector<1x96xf32>
    %190 = vector.broadcast %189 : vector<1x96xf32> to vector<16x96xf32>
    %191 = arith.addf %187, %190 : vector<16x96xf32>
    %192 = vector.extract_strided_slice %191 {offsets = [0, 0], sizes = [16, 32], strides = [1, 1]} : vector<16x96xf32> to vector<16x32xf32>
    %193 = vector.extract_strided_slice %191 {offsets = [0, 32], sizes = [16, 32], strides = [1, 1]} : vector<16x96xf32> to vector<16x32xf32>
    %194 = vector.extract_strided_slice %191 {offsets = [0, 64], sizes = [16, 32], strides = [1, 1]} : vector<16x96xf32> to vector<16x32xf32>
    %c1_82 = arith.constant 1 : index
    %c0_83 = arith.constant 0 : index
    %c0_84 = arith.constant 0 : index
    %195 = vector.load %arg3[%c1_82, %c0_83, %c0_84] : memref<2x32x32xf32, #tpu.memory_space<vmem>>, vector<1x32x32xf32>
    %196 = vector.shape_cast %195 : vector<1x32x32xf32> to vector<32x32xf32>
    %cst_85 = arith.constant 0.000000e+00 : f32
    %197 = vector.broadcast %cst_85 : f32 to vector<16x32xf32>
    %198 = vector.extract_strided_slice %192 {offsets = [0, 0], sizes = [16, 8], strides = [1, 1]} : vector<16x32xf32> to vector<16x8xf32>
    %199 = vector.shape_cast %198 : vector<16x8xf32> to vector<2x8x8xf32>
    %200 = vector.extract_strided_slice %193 {offsets = [0, 0], sizes = [16, 8], strides = [1, 1]} : vector<16x32xf32> to vector<16x8xf32>
    %201 = vector.shape_cast %200 : vector<16x8xf32> to vector<2x8x8xf32>
    %202 = vector.extract_strided_slice %194 {offsets = [0, 0], sizes = [16, 8], strides = [1, 1]} : vector<16x32xf32> to vector<16x8xf32>
    %203 = vector.shape_cast %202 : vector<16x8xf32> to vector<2x8x8xf32>
    "tpu.trace_start"() <{level = 10 : i32, message = "bqd,bkd->bqk"}> : () -> ()
    %cst_86 = arith.constant dense<0.000000e+00> : vector<2x8x8xf32>
    %204 = tpu.matmul %199, %201, %cst_86 {dimension_numbers = #tpu.dot_dimension_numbers<[2], [2], [1], [1], [0, 0, 0, 1, 1, 1], [0], [0]>} : vector<2x8x8xf32>, vector<2x8x8xf32>, vector<2x8x8xf32> -> vector<2x8x8xf32>
    "tpu.trace_stop"() : () -> ()
    %cst_87 = arith.constant 0.353553385 : f32
    %205 = vector.broadcast %cst_87 : f32 to vector<2x8x8xf32>
    %206 = arith.mulf %204, %205 : vector<2x8x8xf32>
    %cst_88 = arith.constant dense<0xFF800000> : vector<2x8xf32>
    %207 = vector.multi_reduction <maximumf>, %206, %cst_88 [2] : vector<2x8x8xf32> to vector<2x8xf32>
    %208 = vector.shape_cast %207 : vector<2x8xf32> to vector<2x8x1xf32>
    %209 = vector.broadcast %208 : vector<2x8x1xf32> to vector<2x8x8xf32>
    %210 = arith.subf %206, %209 : vector<2x8x8xf32>
    %211 = math.exp %210 : vector<2x8x8xf32>
    %cst_89 = arith.constant dense<0.000000e+00> : vector<2x8xf32>
    %212 = vector.multi_reduction <add>, %211, %cst_89 [2] : vector<2x8x8xf32> to vector<2x8xf32>
    %213 = vector.shape_cast %212 : vector<2x8xf32> to vector<2x8x1xf32>
    %214 = tpu.reciprocal %213 {approx = true} : vector<2x8x1xf32> -> vector<2x8x1xf32>
    %215 = vector.broadcast %214 : vector<2x8x1xf32> to vector<2x8x8xf32>
    %216 = arith.mulf %211, %215 : vector<2x8x8xf32>
    "tpu.trace_start"() <{level = 10 : i32, message = "bqk,bkd->bqd"}> : () -> ()
    %cst_90 = arith.constant dense<0.000000e+00> : vector<2x8x8xf32>
    %217 = tpu.matmul %216, %203, %cst_90 {dimension_numbers = #tpu.dot_dimension_numbers<[2], [1], [1], [2], [0, 0, 0, 1, 1, 2], [0], [0]>} : vector<2x8x8xf32>, vector<2x8x8xf32>, vector<2x8x8xf32> -> vector<2x8x8xf32>
    "tpu.trace_stop"() : () -> ()
    %218 = vector.shape_cast %217 : vector<2x8x8xf32> to vector<16x8xf32>
    %219 = vector.extract_strided_slice %196 {offsets = [0, 0], sizes = [8, 32], strides = [1, 1]} : vector<32x32xf32> to vector<8x32xf32>
    %cst_91 = arith.constant dense<0.000000e+00> : vector<16x32xf32>
    %220 = tpu.matmul %218, %219, %cst_91 {dimension_numbers = #tpu.dot_dimension_numbers<[1], [0], [0], [1], [0, 0, 1, 1], [], []>} : vector<16x8xf32>, vector<8x32xf32>, vector<16x32xf32> -> vector<16x32xf32>
    %221 = arith.addf %197, %220 : vector<16x32xf32>
    %222 = vector.extract_strided_slice %192 {offsets = [0, 8], sizes = [16, 8], strides = [1, 1]} : vector<16x32xf32> to vector<16x8xf32>
    %223 = vector.shape_cast %222 : vector<16x8xf32> to vector<2x8x8xf32>
    %224 = vector.extract_strided_slice %193 {offsets = [0, 8], sizes = [16, 8], strides = [1, 1]} : vector<16x32xf32> to vector<16x8xf32>
    %225 = vector.shape_cast %224 : vector<16x8xf32> to vector<2x8x8xf32>
    %226 = vector.extract_strided_slice %194 {offsets = [0, 8], sizes = [16, 8], strides = [1, 1]} : vector<16x32xf32> to vector<16x8xf32>
    %227 = vector.shape_cast %226 : vector<16x8xf32> to vector<2x8x8xf32>
    "tpu.trace_start"() <{level = 10 : i32, message = "bqd,bkd->bqk"}> : () -> ()
    %cst_92 = arith.constant dense<0.000000e+00> : vector<2x8x8xf32>
    %228 = tpu.matmul %223, %225, %cst_92 {dimension_numbers = #tpu.dot_dimension_numbers<[2], [2], [1], [1], [0, 0, 0, 1, 1, 1], [0], [0]>} : vector<2x8x8xf32>, vector<2x8x8xf32>, vector<2x8x8xf32> -> vector<2x8x8xf32>
    "tpu.trace_stop"() : () -> ()
    %cst_93 = arith.constant 0.353553385 : f32
    %229 = vector.broadcast %cst_93 : f32 to vector<2x8x8xf32>
    %230 = arith.mulf %228, %229 : vector<2x8x8xf32>
    %cst_94 = arith.constant dense<0xFF800000> : vector<2x8xf32>
    %231 = vector.multi_reduction <maximumf>, %230, %cst_94 [2] : vector<2x8x8xf32> to vector<2x8xf32>
    %232 = vector.shape_cast %231 : vector<2x8xf32> to vector<2x8x1xf32>
    %233 = vector.broadcast %232 : vector<2x8x1xf32> to vector<2x8x8xf32>
    %234 = arith.subf %230, %233 : vector<2x8x8xf32>
    %235 = math.exp %234 : vector<2x8x8xf32>
    %cst_95 = arith.constant dense<0.000000e+00> : vector<2x8xf32>
    %236 = vector.multi_reduction <add>, %235, %cst_95 [2] : vector<2x8x8xf32> to vector<2x8xf32>
    %237 = vector.shape_cast %236 : vector<2x8xf32> to vector<2x8x1xf32>
    %238 = tpu.reciprocal %237 {approx = true} : vector<2x8x1xf32> -> vector<2x8x1xf32>
    %239 = vector.broadcast %238 : vector<2x8x1xf32> to vector<2x8x8xf32>
    %240 = arith.mulf %235, %239 : vector<2x8x8xf32>
    "tpu.trace_start"() <{level = 10 : i32, message = "bqk,bkd->bqd"}> : () -> ()
    %cst_96 = arith.constant dense<0.000000e+00> : vector<2x8x8xf32>
    %241 = tpu.matmul %240, %227, %cst_96 {dimension_numbers = #tpu.dot_dimension_numbers<[2], [1], [1], [2], [0, 0, 0, 1, 1, 2], [0], [0]>} : vector<2x8x8xf32>, vector<2x8x8xf32>, vector<2x8x8xf32> -> vector<2x8x8xf32>
    "tpu.trace_stop"() : () -> ()
    %242 = vector.shape_cast %241 : vector<2x8x8xf32> to vector<16x8xf32>
    %243 = vector.extract_strided_slice %196 {offsets = [8, 0], sizes = [8, 32], strides = [1, 1]} : vector<32x32xf32> to vector<8x32xf32>
    %cst_97 = arith.constant dense<0.000000e+00> : vector<16x32xf32>
    %244 = tpu.matmul %242, %243, %cst_97 {dimension_numbers = #tpu.dot_dimension_numbers<[1], [0], [0], [1], [0, 0, 1, 1], [], []>} : vector<16x8xf32>, vector<8x32xf32>, vector<16x32xf32> -> vector<16x32xf32>
    %245 = arith.addf %221, %244 : vector<16x32xf32>
    %246 = vector.extract_strided_slice %192 {offsets = [0, 16], sizes = [16, 8], strides = [1, 1]} : vector<16x32xf32> to vector<16x8xf32>
    %247 = vector.shape_cast %246 : vector<16x8xf32> to vector<2x8x8xf32>
    %248 = vector.extract_strided_slice %193 {offsets = [0, 16], sizes = [16, 8], strides = [1, 1]} : vector<16x32xf32> to vector<16x8xf32>
    %249 = vector.shape_cast %248 : vector<16x8xf32> to vector<2x8x8xf32>
    %250 = vector.extract_strided_slice %194 {offsets = [0, 16], sizes = [16, 8], strides = [1, 1]} : vector<16x32xf32> to vector<16x8xf32>
    %251 = vector.shape_cast %250 : vector<16x8xf32> to vector<2x8x8xf32>
    "tpu.trace_start"() <{level = 10 : i32, message = "bqd,bkd->bqk"}> : () -> ()
    %cst_98 = arith.constant dense<0.000000e+00> : vector<2x8x8xf32>
    %252 = tpu.matmul %247, %249, %cst_98 {dimension_numbers = #tpu.dot_dimension_numbers<[2], [2], [1], [1], [0, 0, 0, 1, 1, 1], [0], [0]>} : vector<2x8x8xf32>, vector<2x8x8xf32>, vector<2x8x8xf32> -> vector<2x8x8xf32>
    "tpu.trace_stop"() : () -> ()
    %cst_99 = arith.constant 0.353553385 : f32
    %253 = vector.broadcast %cst_99 : f32 to vector<2x8x8xf32>
    %254 = arith.mulf %252, %253 : vector<2x8x8xf32>
    %cst_100 = arith.constant dense<0xFF800000> : vector<2x8xf32>
    %255 = vector.multi_reduction <maximumf>, %254, %cst_100 [2] : vector<2x8x8xf32> to vector<2x8xf32>
    %256 = vector.shape_cast %255 : vector<2x8xf32> to vector<2x8x1xf32>
    %257 = vector.broadcast %256 : vector<2x8x1xf32> to vector<2x8x8xf32>
    %258 = arith.subf %254, %257 : vector<2x8x8xf32>
    %259 = math.exp %258 : vector<2x8x8xf32>
    %cst_101 = arith.constant dense<0.000000e+00> : vector<2x8xf32>
    %260 = vector.multi_reduction <add>, %259, %cst_101 [2] : vector<2x8x8xf32> to vector<2x8xf32>
    %261 = vector.shape_cast %260 : vector<2x8xf32> to vector<2x8x1xf32>
    %262 = tpu.reciprocal %261 {approx = true} : vector<2x8x1xf32> -> vector<2x8x1xf32>
    %263 = vector.broadcast %262 : vector<2x8x1xf32> to vector<2x8x8xf32>
    %264 = arith.mulf %259, %263 : vector<2x8x8xf32>
    "tpu.trace_start"() <{level = 10 : i32, message = "bqk,bkd->bqd"}> : () -> ()
    %cst_102 = arith.constant dense<0.000000e+00> : vector<2x8x8xf32>
    %265 = tpu.matmul %264, %251, %cst_102 {dimension_numbers = #tpu.dot_dimension_numbers<[2], [1], [1], [2], [0, 0, 0, 1, 1, 2], [0], [0]>} : vector<2x8x8xf32>, vector<2x8x8xf32>, vector<2x8x8xf32> -> vector<2x8x8xf32>
    "tpu.trace_stop"() : () -> ()
    %266 = vector.shape_cast %265 : vector<2x8x8xf32> to vector<16x8xf32>
    %267 = vector.extract_strided_slice %196 {offsets = [16, 0], sizes = [8, 32], strides = [1, 1]} : vector<32x32xf32> to vector<8x32xf32>
    %cst_103 = arith.constant dense<0.000000e+00> : vector<16x32xf32>
    %268 = tpu.matmul %266, %267, %cst_103 {dimension_numbers = #tpu.dot_dimension_numbers<[1], [0], [0], [1], [0, 0, 1, 1], [], []>} : vector<16x8xf32>, vector<8x32xf32>, vector<16x32xf32> -> vector<16x32xf32>
    %269 = arith.addf %245, %268 : vector<16x32xf32>
    %270 = vector.extract_strided_slice %192 {offsets = [0, 24], sizes = [16, 8], strides = [1, 1]} : vector<16x32xf32> to vector<16x8xf32>
    %271 = vector.shape_cast %270 : vector<16x8xf32> to vector<2x8x8xf32>
    %272 = vector.extract_strided_slice %193 {offsets = [0, 24], sizes = [16, 8], strides = [1, 1]} : vector<16x32xf32> to vector<16x8xf32>
    %273 = vector.shape_cast %272 : vector<16x8xf32> to vector<2x8x8xf32>
    %274 = vector.extract_strided_slice %194 {offsets = [0, 24], sizes = [16, 8], strides = [1, 1]} : vector<16x32xf32> to vector<16x8xf32>
    %275 = vector.shape_cast %274 : vector<16x8xf32> to vector<2x8x8xf32>
    "tpu.trace_start"() <{level = 10 : i32, message = "bqd,bkd->bqk"}> : () -> ()
    %cst_104 = arith.constant dense<0.000000e+00> : vector<2x8x8xf32>
    %276 = tpu.matmul %271, %273, %cst_104 {dimension_numbers = #tpu.dot_dimension_numbers<[2], [2], [1], [1], [0, 0, 0, 1, 1, 1], [0], [0]>} : vector<2x8x8xf32>, vector<2x8x8xf32>, vector<2x8x8xf32> -> vector<2x8x8xf32>
    "tpu.trace_stop"() : () -> ()
    %cst_105 = arith.constant 0.353553385 : f32
    %277 = vector.broadcast %cst_105 : f32 to vector<2x8x8xf32>
    %278 = arith.mulf %276, %277 : vector<2x8x8xf32>
    %cst_106 = arith.constant dense<0xFF800000> : vector<2x8xf32>
    %279 = vector.multi_reduction <maximumf>, %278, %cst_106 [2] : vector<2x8x8xf32> to vector<2x8xf32>
    %280 = vector.shape_cast %279 : vector<2x8xf32> to vector<2x8x1xf32>
    %281 = vector.broadcast %280 : vector<2x8x1xf32> to vector<2x8x8xf32>
    %282 = arith.subf %278, %281 : vector<2x8x8xf32>
    %283 = math.exp %282 : vector<2x8x8xf32>
    %cst_107 = arith.constant dense<0.000000e+00> : vector<2x8xf32>
    %284 = vector.multi_reduction <add>, %283, %cst_107 [2] : vector<2x8x8xf32> to vector<2x8xf32>
    %285 = vector.shape_cast %284 : vector<2x8xf32> to vector<2x8x1xf32>
    %286 = tpu.reciprocal %285 {approx = true} : vector<2x8x1xf32> -> vector<2x8x1xf32>
    %287 = vector.broadcast %286 : vector<2x8x1xf32> to vector<2x8x8xf32>
    %288 = arith.mulf %283, %287 : vector<2x8x8xf32>
    "tpu.trace_start"() <{level = 10 : i32, message = "bqk,bkd->bqd"}> : () -> ()
    %cst_108 = arith.constant dense<0.000000e+00> : vector<2x8x8xf32>
    %289 = tpu.matmul %288, %275, %cst_108 {dimension_numbers = #tpu.dot_dimension_numbers<[2], [1], [1], [2], [0, 0, 0, 1, 1, 2], [0], [0]>} : vector<2x8x8xf32>, vector<2x8x8xf32>, vector<2x8x8xf32> -> vector<2x8x8xf32>
    "tpu.trace_stop"() : () -> ()
    %290 = vector.shape_cast %289 : vector<2x8x8xf32> to vector<16x8xf32>
    %291 = vector.extract_strided_slice %196 {offsets = [24, 0], sizes = [8, 32], strides = [1, 1]} : vector<32x32xf32> to vector<8x32xf32>
    %cst_109 = arith.constant dense<0.000000e+00> : vector<16x32xf32>
    %292 = tpu.matmul %290, %291, %cst_109 {dimension_numbers = #tpu.dot_dimension_numbers<[1], [0], [0], [1], [0, 0, 1, 1], [], []>} : vector<16x8xf32>, vector<8x32xf32>, vector<16x32xf32> -> vector<16x32xf32>
    %293 = arith.addf %269, %292 : vector<16x32xf32>
    %c1_110 = arith.constant 1 : index
    %c0_111 = arith.constant 0 : index
    %c0_112 = arith.constant 0 : index
    %294 = vector.load %arg4[%c1_110, %c0_111, %c0_112] : memref<2x1x32xf32, #tpu.memory_space<vmem>>, vector<1x1x32xf32>
    %295 = vector.shape_cast %294 : vector<1x1x32xf32> to vector<1x32xf32>
    %296 = vector.broadcast %295 : vector<1x32xf32> to vector<16x32xf32>
    %297 = arith.addf %293, %296 : vector<16x32xf32>
    %298 = arith.addf %184, %297 : vector<16x32xf32>
    %c1_113 = arith.constant 1 : index
    %c0_114 = arith.constant 0 : index
    %c0_115 = arith.constant 0 : index
    %299 = vector.load %arg5[%c1_113, %c0_114, %c0_115] : memref<2x1x32xf32, #tpu.memory_space<vmem>>, vector<1x1x32xf32>
    %300 = vector.shape_cast %299 : vector<1x1x32xf32> to vector<1x32xf32>
    %c1_116 = arith.constant 1 : index
    %c0_117 = arith.constant 0 : index
    %c0_118 = arith.constant 0 : index
    %301 = vector.load %arg6[%c1_116, %c0_117, %c0_118] : memref<2x1x32xf32, #tpu.memory_space<vmem>>, vector<1x1x32xf32>
    %302 = vector.shape_cast %301 : vector<1x1x32xf32> to vector<1x32xf32>
    %cst_119 = arith.constant dense<0.000000e+00> : vector<16xf32>
    %303 = vector.multi_reduction <add>, %298, %cst_119 [1] : vector<16x32xf32> to vector<16xf32>
    %304 = vector.shape_cast %303 : vector<16xf32> to vector<16x1xf32>
    %cst_120 = arith.constant 3.200000e+01 : f32
    %305 = vector.broadcast %cst_120 : f32 to vector<16x1xf32>
    %306 = arith.divf %304, %305 : vector<16x1xf32>
    %307 = vector.broadcast %306 : vector<16x1xf32> to vector<16x32xf32>
    %308 = arith.subf %298, %307 : vector<16x32xf32>
    %309 = arith.mulf %308, %308 : vector<16x32xf32>
    %cst_121 = arith.constant dense<0.000000e+00> : vector<16xf32>
    %310 = vector.multi_reduction <add>, %309, %cst_121 [1] : vector<16x32xf32> to vector<16xf32>
    %311 = vector.shape_cast %310 : vector<16xf32> to vector<16x1xf32>
    %cst_122 = arith.constant 3.200000e+01 : f32
    %312 = vector.broadcast %cst_122 : f32 to vector<16x1xf32>
    %313 = arith.divf %311, %312 : vector<16x1xf32>
    %314 = vector.broadcast %306 : vector<16x1xf32> to vector<16x32xf32>
    %315 = arith.subf %298, %314 : vector<16x32xf32>
    %cst_123 = arith.constant 9.99999974E-6 : f32
    %316 = vector.broadcast %cst_123 : f32 to vector<16x1xf32>
    %317 = arith.addf %313, %316 : vector<16x1xf32>
    %318 = math.rsqrt %317 : vector<16x1xf32>
    %319 = vector.broadcast %318 : vector<16x1xf32> to vector<16x32xf32>
    %320 = arith.mulf %315, %319 : vector<16x32xf32>
    %321 = vector.broadcast %300 : vector<1x32xf32> to vector<16x32xf32>
    %322 = arith.mulf %320, %321 : vector<16x32xf32>
    %323 = vector.broadcast %302 : vector<1x32xf32> to vector<16x32xf32>
    %324 = arith.addf %322, %323 : vector<16x32xf32>
    %c1_124 = arith.constant 1 : index
    %c0_125 = arith.constant 0 : index
    %c0_126 = arith.constant 0 : index
    %325 = vector.load %arg9[%c1_124, %c0_125, %c0_126] : memref<2x32x64xf32, #tpu.memory_space<vmem>>, vector<1x32x64xf32>
    %326 = vector.shape_cast %325 : vector<1x32x64xf32> to vector<32x64xf32>
    %cst_127 = arith.constant dense<0.000000e+00> : vector<16x64xf32>
    %327 = tpu.matmul %324, %326, %cst_127 {dimension_numbers = #tpu.dot_dimension_numbers<[1], [0], [0], [1], [0, 0, 1, 1], [], []>} : vector<16x32xf32>, vector<32x64xf32>, vector<16x64xf32> -> vector<16x64xf32>
    %c1_128 = arith.constant 1 : index
    %c0_129 = arith.constant 0 : index
    %c0_130 = arith.constant 0 : index
    %328 = vector.load %arg10[%c1_128, %c0_129, %c0_130] : memref<2x1x64xf32, #tpu.memory_space<vmem>>, vector<1x1x64xf32>
    %329 = vector.shape_cast %328 : vector<1x1x64xf32> to vector<1x64xf32>
    %330 = vector.broadcast %329 : vector<1x64xf32> to vector<16x64xf32>
    %331 = arith.addf %327, %330 : vector<16x64xf32>
    %cst_131 = arith.constant 0.000000e+00 : f32
    %332 = vector.broadcast %cst_131 : f32 to vector<16x64xf32>
    %333 = arith.maximumf %331, %332 : vector<16x64xf32>
    %c1_132 = arith.constant 1 : index
    %c0_133 = arith.constant 0 : index
    %c0_134 = arith.constant 0 : index
    %334 = vector.load %arg11[%c1_132, %c0_133, %c0_134] : memref<2x64x32xf32, #tpu.memory_space<vmem>>, vector<1x64x32xf32>
    %335 = vector.shape_cast %334 : vector<1x64x32xf32> to vector<64x32xf32>
    %cst_135 = arith.constant dense<0.000000e+00> : vector<16x32xf32>
    %336 = tpu.matmul %333, %335, %cst_135 {dimension_numbers = #tpu.dot_dimension_numbers<[1], [0], [0], [1], [0, 0, 1, 1], [], []>} : vector<16x64xf32>, vector<64x32xf32>, vector<16x32xf32> -> vector<16x32xf32>
    %c1_136 = arith.constant 1 : index
    %c0_137 = arith.constant 0 : index
    %c0_138 = arith.constant 0 : index
    %337 = vector.load %arg12[%c1_136, %c0_137, %c0_138] : memref<2x1x32xf32, #tpu.memory_space<vmem>>, vector<1x1x32xf32>
    %338 = vector.shape_cast %337 : vector<1x1x32xf32> to vector<1x32xf32>
    %339 = vector.broadcast %338 : vector<1x32xf32> to vector<16x32xf32>
    %340 = arith.addf %336, %339 : vector<16x32xf32>
    %341 = arith.addf %324, %340 : vector<16x32xf32>
    %c1_139 = arith.constant 1 : index
    %c0_140 = arith.constant 0 : index
    %c0_141 = arith.constant 0 : index
    %342 = vector.load %arg7[%c1_139, %c0_140, %c0_141] : memref<2x1x32xf32, #tpu.memory_space<vmem>>, vector<1x1x32xf32>
    %343 = vector.shape_cast %342 : vector<1x1x32xf32> to vector<1x32xf32>
    %c1_142 = arith.constant 1 : index
    %c0_143 = arith.constant 0 : index
    %c0_144 = arith.constant 0 : index
    %344 = vector.load %arg8[%c1_142, %c0_143, %c0_144] : memref<2x1x32xf32, #tpu.memory_space<vmem>>, vector<1x1x32xf32>
    %345 = vector.shape_cast %344 : vector<1x1x32xf32> to vector<1x32xf32>
    %cst_145 = arith.constant dense<0.000000e+00> : vector<16xf32>
    %346 = vector.multi_reduction <add>, %341, %cst_145 [1] : vector<16x32xf32> to vector<16xf32>
    %347 = vector.shape_cast %346 : vector<16xf32> to vector<16x1xf32>
    %cst_146 = arith.constant 3.200000e+01 : f32
    %348 = vector.broadcast %cst_146 : f32 to vector<16x1xf32>
    %349 = arith.divf %347, %348 : vector<16x1xf32>
    %350 = vector.broadcast %349 : vector<16x1xf32> to vector<16x32xf32>
    %351 = arith.subf %341, %350 : vector<16x32xf32>
    %352 = arith.mulf %351, %351 : vector<16x32xf32>
    %cst_147 = arith.constant dense<0.000000e+00> : vector<16xf32>
    %353 = vector.multi_reduction <add>, %352, %cst_147 [1] : vector<16x32xf32> to vector<16xf32>
    %354 = vector.shape_cast %353 : vector<16xf32> to vector<16x1xf32>
    %cst_148 = arith.constant 3.200000e+01 : f32
    %355 = vector.broadcast %cst_148 : f32 to vector<16x1xf32>
    %356 = arith.divf %354, %355 : vector<16x1xf32>
    %357 = vector.broadcast %349 : vector<16x1xf32> to vector<16x32xf32>
    %358 = arith.subf %341, %357 : vector<16x32xf32>
    %cst_149 = arith.constant 9.99999974E-6 : f32
    %359 = vector.broadcast %cst_149 : f32 to vector<16x1xf32>
    %360 = arith.addf %356, %359 : vector<16x1xf32>
    %361 = math.rsqrt %360 : vector<16x1xf32>
    %362 = vector.broadcast %361 : vector<16x1xf32> to vector<16x32xf32>
    %363 = arith.mulf %358, %362 : vector<16x32xf32>
    %364 = vector.broadcast %343 : vector<1x32xf32> to vector<16x32xf32>
    %365 = arith.mulf %363, %364 : vector<16x32xf32>
    %366 = vector.broadcast %345 : vector<1x32xf32> to vector<16x32xf32>
    %367 = arith.addf %365, %366 : vector<16x32xf32>
    %368 = vector.shape_cast %367 : vector<16x32xf32> to vector<2x8x32xf32>
    %c0_150 = arith.constant 0 : index
    %c0_151 = arith.constant 0 : index
    %c0_152 = arith.constant 0 : index
    %369 = vector.load %arg19[%c0_150, %c0_151, %c0_152] : memref<2x8x32xf32, #tpu.memory_space<vmem>>, vector<2x8x32xf32>
    tpu.vector_store %arg19[%c0_150, %c0_151, %c0_152], %368 {strides = array<i32>} : memref<2x8x32xf32, #tpu.memory_space<vmem>>, vector<2x8x32xf32>,
    %370 = vector.extract_strided_slice %368 {offsets = [0, 0, 0], sizes = [2, 1, 32], strides = [1, 1, 1]} : vector<2x8x32xf32> to vector<2x1x32xf32>
    %371 = vector.shape_cast %370 : vector<2x1x32xf32> to vector<2x32xf32>
    %372 = vector.extract_strided_slice %368 {offsets = [0, 1, 0], sizes = [2, 1, 32], strides = [1, 1, 1]} : vector<2x8x32xf32> to vector<2x1x32xf32>
    %373 = vector.shape_cast %372 : vector<2x1x32xf32> to vector<2x32xf32>
    %c0_153 = arith.constant 0 : index
    %c0_154 = arith.constant 0 : index
    %374 = vector.load %arg13[%c0_153, %c0_154] : memref<32x8xf32, #tpu.memory_space<vmem>>, vector<32x8xf32>
    %cst_155 = arith.constant dense<0.000000e+00> : vector<2x8xf32>
    %375 = tpu.matmul %371, %374, %cst_155 {dimension_numbers = #tpu.dot_dimension_numbers<[1], [0], [0], [1], [0, 0, 1, 1], [], []>} : vector<2x32xf32>, vector<32x8xf32>, vector<2x8xf32> -> vector<2x8xf32>
    %c0_156 = arith.constant 0 : index
    %c0_157 = arith.constant 0 : index
    %376 = vector.load %arg14[%c0_156, %c0_157] : memref<1x8xf32, #tpu.memory_space<vmem>>, vector<1x8xf32>
    %377 = vector.broadcast %376 : vector<1x8xf32> to vector<2x8xf32>
    %378 = arith.addf %375, %377 : vector<2x8xf32>
    %cst_158 = arith.constant dense<0xFF800000> : vector<2xf32>
    %379 = vector.multi_reduction <maximumf>, %378, %cst_158 [1] : vector<2x8xf32> to vector<2xf32>
    %380 = vector.shape_cast %379 : vector<2xf32> to vector<2x1xf32>
    %381 = vector.broadcast %380 : vector<2x1xf32> to vector<2x8xf32>
    %382 = arith.subf %378, %381 : vector<2x8xf32>
    %383 = math.exp %382 : vector<2x8xf32>
    %cst_159 = arith.constant dense<0.000000e+00> : vector<2xf32>
    %384 = vector.multi_reduction <add>, %383, %cst_159 [1] : vector<2x8xf32> to vector<2xf32>
    %385 = vector.shape_cast %384 : vector<2xf32> to vector<2x1xf32>
    %386 = tpu.reciprocal %385 {approx = true} : vector<2x1xf32> -> vector<2x1xf32>
    %387 = vector.broadcast %386 : vector<2x1xf32> to vector<2x8xf32>
    %388 = arith.mulf %383, %387 : vector<2x8xf32>
    %c0_160 = arith.constant 0 : index
    %c0_161 = arith.constant 0 : index
    %389 = vector.load %arg20[%c0_160, %c0_161] : memref<2x8xf32, #tpu.memory_space<vmem>>, vector<2x8xf32>
    tpu.vector_store %arg20[%c0_160, %c0_161], %388 {strides = array<i32>} : memref<2x8xf32, #tpu.memory_space<vmem>>, vector<2x8xf32>,
    %c0_162 = arith.constant 0 : index
    %c0_163 = arith.constant 0 : index
    %390 = vector.load %arg15[%c0_162, %c0_163] : memref<32x16xf32, #tpu.memory_space<vmem>>, vector<32x16xf32>
    %cst_164 = arith.constant dense<0.000000e+00> : vector<2x16xf32>
    %391 = tpu.matmul %373, %390, %cst_164 {dimension_numbers = #tpu.dot_dimension_numbers<[1], [0], [0], [1], [0, 0, 1, 1], [], []>} : vector<2x32xf32>, vector<32x16xf32>, vector<2x16xf32> -> vector<2x16xf32>
    %c0_165 = arith.constant 0 : index
    %c0_166 = arith.constant 0 : index
    %392 = vector.load %arg16[%c0_165, %c0_166] : memref<1x16xf32, #tpu.memory_space<vmem>>, vector<1x16xf32>
    %393 = vector.broadcast %392 : vector<1x16xf32> to vector<2x16xf32>
    %394 = arith.addf %391, %393 : vector<2x16xf32>
    %c0_167 = arith.constant 0 : index
    %c0_168 = arith.constant 0 : index
    %395 = vector.load %arg21[%c0_167, %c0_168] : memref<2x16xf32, #tpu.memory_space<vmem>>, vector<2x16xf32>
    tpu.vector_store %arg21[%c0_167, %c0_168], %394 {strides = array<i32>} : memref<2x16xf32, #tpu.memory_space<vmem>>, vector<2x16xf32>,
    %c0_169 = arith.constant 0 : index
    %c0_170 = arith.constant 0 : index
    %396 = vector.load %arg17[%c0_169, %c0_170] : memref<32x4xf32, #tpu.memory_space<vmem>>, vector<32x4xf32>
    %cst_171 = arith.constant dense<0.000000e+00> : vector<16x4xf32>
    %397 = tpu.matmul %367, %396, %cst_171 {dimension_numbers = #tpu.dot_dimension_numbers<[1], [0], [0], [1], [0, 0, 1, 1], [], []>} : vector<16x32xf32>, vector<32x4xf32>, vector<16x4xf32> -> vector<16x4xf32>
    %c0_172 = arith.constant 0 : index
    %c0_173 = arith.constant 0 : index
    %398 = vector.load %arg18[%c0_172, %c0_173] : memref<1x4xf32, #tpu.memory_space<vmem>>, vector<1x4xf32>
    %399 = vector.broadcast %398 : vector<1x4xf32> to vector<16x4xf32>
    %400 = arith.addf %397, %399 : vector<16x4xf32>
    %401 = vector.shape_cast %400 : vector<16x4xf32> to vector<2x8x4xf32>
    %402 = vector.extract_strided_slice %401 {offsets = [0, 2, 0], sizes = [2, 6, 4], strides = [1, 1, 1]} : vector<2x8x4xf32> to vector<2x6x4xf32>
    %cst_174 = arith.constant dense<0xFF800000> : vector<2x4xf32>
    %403 = vector.multi_reduction <maximumf>, %402, %cst_174 [1] : vector<2x6x4xf32> to vector<2x4xf32>
    %404 = vector.shape_cast %403 : vector<2x4xf32> to vector<2x1x4xf32>
    %405 = vector.broadcast %404 : vector<2x1x4xf32> to vector<2x6x4xf32>
    %406 = arith.subf %402, %405 : vector<2x6x4xf32>
    %407 = math.exp %406 : vector<2x6x4xf32>
    %cst_175 = arith.constant dense<0.000000e+00> : vector<2x4xf32>
    %408 = vector.multi_reduction <add>, %407, %cst_175 [1] : vector<2x6x4xf32> to vector<2x4xf32>
    %409 = vector.shape_cast %408 : vector<2x4xf32> to vector<2x1x4xf32>
    %410 = tpu.reciprocal %409 {approx = true} : vector<2x1x4xf32> -> vector<2x1x4xf32>
    %411 = vector.broadcast %410 : vector<2x1x4xf32> to vector<2x6x4xf32>
    %412 = arith.mulf %407, %411 : vector<2x6x4xf32>
    %c0_176 = arith.constant 0 : index
    %c0_177 = arith.constant 0 : index
    %c0_178 = arith.constant 0 : index
    %413 = vector.load %arg22[%c0_176, %c0_177, %c0_178] : memref<2x6x4xf32, #tpu.memory_space<vmem>>, vector<2x6x4xf32>
    tpu.vector_store %arg22[%c0_176, %c0_177, %c0_178], %412 {strides = array<i32>} : memref<2x6x4xf32, #tpu.memory_space<vmem>>, vector<2x6x4xf32>,
    return
  }
}

</mosaic_0001>

<bundles_post_ra>
// kernel: tpu_custom_call.1
= control target key start
LH: loop header
LB: loop body
LE: loop exit
PB: predicated region body
PF: predicated region fallthrough
CT: control target
= control target key end

     0   :  { %s6172_s0 = inlined_call_operand.vmem [shape: f32[2,8,32], index: 0, kind: input, shape index: {}]   ;;  %s6173_s1 = inlined_call_operand.vmem [shape: f32[2,32,96], index: 1, kind: input, shape index: {}]   ;;  %s6174_s2 = inlined_call_operand.vmem [shape: f32[2,1,96], index: 2, kind: input, shape index: {}]   ;;  %s6175_s3 = inlined_call_operand.vmem [shape: f32[2,32,32], index: 3, kind: input, shape index: {}]   ;;  %s6176_s4 = inlined_call_operand.vmem [shape: f32[2,1,32], index: 4, kind: input, shape index: {}]   ;;  %s6177_s5 = inlined_call_operand.vmem [shape: f32[2,1,32], index: 5, kind: input, shape index: {}]   ;;  %s6178_s6 = inlined_call_operand.vmem [shape: f32[2,1,32], index: 6, kind: input, shape index: {}]   ;;  %s6179_s7 = inlined_call_operand.vmem [shape: f32[2,1,32], index: 7, kind: input, shape index: {}]   ;;  %s6180_s8 = inlined_call_operand.vmem [shape: f32[2,1,32], index: 8, kind: input, shape index: {}]   ;;  %s6181_s9 = inlined_call_operand.vmem [shape: f32[2,32,64], index: 9, kind: input, shape index: {}]   ;;  %s6182_s10 = inlined_call_operand.vmem [shape: f32[2,1,64], index: 10, kind: input, shape index: {}]   ;;  %s6183_s11 = inlined_call_operand.vmem [shape: f32[2,64,32], index: 11, kind: input, shape index: {}]   ;;  %s6184_s12 = inlined_call_operand.vmem [shape: f32[2,1,32], index: 12, kind: input, shape index: {}]   ;;  %s6185_s13 = inlined_call_operand.vmem [shape: f32[32,8], index: 13, kind: input, shape index: {}]   ;;  %s6186_s14 = inlined_call_operand.vmem [shape: f32[1,8], index: 14, kind: input, shape index: {}]   ;;  %s6187_s15 = inlined_call_operand.vmem [shape: f32[32,16], index: 15, kind: input, shape index: {}]   ;;  %s6188_s16 = inlined_call_operand.vmem [shape: f32[1,16], index: 16, kind: input, shape index: {}]   ;;  %s6189_s17 = inlined_call_operand.vmem [shape: f32[32,4], index: 17, kind: input, shape index: {}]   ;;  %s6190_s18 = inlined_call_operand.vmem [shape: f32[1,4], index: 18, kind: input, shape index: {}]   ;;  %s6191_s19 = inlined_call_operand.hbm [shape: f32[2,8,32], index: 19, kind: output, shape index: {0}]   ;;  %s6192_s20 = inlined_call_operand.hbm [shape: f32[2,8], index: 20, kind: output, shape index: {1}]   ;;  %s6193_s21 = inlined_call_operand.hbm [shape: f32[2,16], index: 21, kind: output, shape index: {2}]   ;;  %s6194_s22 = inlined_call_operand.vmem [shape: f32[2,6,4], index: 22, kind: output, shape index: {3}]  }
   0x1   :  { %6222 = sst [smem:[#allocation9_spill]] %s6172_s0 }
   0x2   :  { %6223 = sst [smem:[#allocation10_spill]] %s6173_s1 }
   0x3   :  { %6224 = sst [smem:[#allocation11_spill]] %s6174_s2 }
   0x4   :  { %6225 = sst [smem:[#allocation12_spill]] %s6175_s3 }
   0x5   :  { %6226 = sst [smem:[#allocation13_spill]] %s6176_s4 }
   0x6   :  { %6227 = sst [smem:[#allocation14_spill]] %s6177_s5 }
   0x7   :  { %6228 = sst [smem:[#allocation15_spill]] %s6178_s6 }
   0x8   :  { %28 = vsyncpa [#allocation3], 0  ;;  %s6229_s29 = sld [smem:[#allocation10_spill]]  ;;  %vm81_vm0 = vcmask 261120   ;;  %s6230_s25 = sld [smem:[#allocation9_spill]] }
   0xe   :  { %v70_v0 = vld [vmem:[%s6229_s29] sm:$0xff]  ;;  %v71_v1 = vld [vmem:[%s6229_s29 + $0x8] sm:$0xff]  ;;  %v72_v2 = vld [vmem:[%s6229_s29 + $0x10] sm:$0xff] }
   0xf   :  { %v5133_v3 = vpack.c.bf16 %v71_v1, %v70_v0  ;;  %v73_v4 = vld [vmem:[%s6229_s29 + $0x18] sm:$0xff]  ;;  %v5559_v5 = vld [vmem:[%s6230_s25] sm:$0xff] }
  0x10   :  { %v5137_v6 = vpack.c.bf16 %v73_v4, %v72_v2  ;;  %4826 = vmatprep.mubr.msk.f32.mxu0 %vm81_vm0, %v5559_v5 }
  0x11   :  { %29 = vsyncpa [#allocation5], 0  ;;  %5134 = vmatprep.subr.bf16.mxu0 %v5133_v3  ;;  %v5566_v7 = vld [vmem:[%s6230_s25 + $0x8] sm:$0xff]  ;;  %v5410_v8 = vmov 0.0   ;;  %vm5411_vm1 = vmmov 0   ;;  %s6231_s28 = sld [smem:[#allocation11_spill]] }
  0x12   :  { %5136 = vmatpush3.bf16.msra.mxu0 %v5133_v3  ;;  %4829 = vmatprep.subr.mxu1 %v5410_v8  ;;  %s5412_s30 = smov 96   ;;  %vm170_vm2 = vcmask 64512   ;;  %s6220_s4 = smov 64   ;;  %vm1987_vm3 = vcmask 523264   ;;  %vm4184_vm4 = vcmask 1041409   ;;  %vm4448_vm5 = vcmask 31746  }
  0x13   :  { %5138 = vmatprep.subr.bf16.mxu0 %v5137_v6  ;;  %4831 = vmatprep.mubr.msk.f32.mxu1 %vm5411_vm1, %v5410_v8  ;;  %s6216_s0 = smov 88   ;;  %s6218_s23 = smov 120   ;;  %vm4258_vm6 = vcmask 58368   ;;  %vm4356_vm7 = vcmask 123904   ;;  %vm4475_vm8 = vcmask 29696  }
  0x14   :  { %s6212_s1 = smov 56   ;;  %s6204_s5 = smov 112  }
  0x15   :  { %s6214_s24 = smov 80   ;;  %s6210_s6 = smov 48  }
  0x16   :  { %5140 = vmatpush3.bf16.msra.mxu0 %v5137_v6  ;;  %s6202_s25 = smov 72   ;;  %s6208_s26 = smov 104  }
  0x17   :  { %4849 = vmatprep.subr.mxu0 %v5410_v8  ;;  %v4543_v9 = vld [vmem:[%s6231_s28] ss:$0 sm:$0xff]  ;;  %s6232_s3 = sld [smem:[#allocation12_spill]]  ;;  %s6206_s2 = smov 40  }
  0x18   :  { %s6233_s27 = sld [smem:[#allocation13_spill]] }
  0x19   :  { %4827 = vmatmul.mubr.msk.f32.vlgmr.msra.gmra.mrb[0].mxu0 %vm81_vm0, %v5566_v7 }
  0x1a   :  { %4851 = vmatprep.mubr.msk.f32.mxu0 %vm5411_vm1, %v5410_v8 }
  0xec   :  { %v4828_v10 = vpop.f32.mrb[0].mxu0 }
  0xed   :  { %v154_v11 = vpop.f32.mrb[1].mxu0  ;;  %v5583_v13 = vadd.f32 %v4828_v10, %v4543_v9 }
  0xee   :  { %v5579_v12 = vadd.f32 %v4543_v9, %v154_v11 }
  0xf0   :  { %168 = vrot.lane.b32.xlu0 %v5579_v12, %s5412_s30 }
  0xf4   :  { %246 = vrot.lane.b32.xlu0 %v5583_v13, %s5412_s30 }
 0x162   :  { %v169_v14 = vpop.permute.xlu0 %168 }
 0x163   :  { %4830 = vmatpush3.xpose.msk.msra.mxu1 %vm170_vm2, %v169_v14 }
 0x164   :  { %4834 = vmatprep.subr.mxu1 %v5410_v8 }
 0x166   :  { %4832 = vmatmul.mubr.msk.f32.vlgmr.msra.gmra.mrb[0].mxu1 %vm170_vm2, %v5579_v12  ;;  %v247_v15 = vpop.permute.xlu0 %246 }
 0x167   :  { %4835 = vmatpush3.xpose.msk.msra.mxu1 %vm170_vm2, %v247_v15  ;;  %4836 = vmatprep.mubr.msk.f32.mxu1 %vm5411_vm1, %v5410_v8 }
 0x168   :  { %4839 = vmatprep.subr.mxu1 %v5410_v8 }
 0x16a   :  { %4837 = vmatmul.mubr.msk.f32.vlgmr.msra.gmra.mrb[2].mxu1 %vm170_vm2, %v5583_v13 }
 0x16b   :  { %4841 = vmatprep.mubr.msk.f32.mxu1 %vm5411_vm1, %v5410_v8 }
 0x239   :  { %v241_v16 = vpop.f32.mrb[0].mxu1 }
 0x23a   :  { %v322_v17 = vmul.f32 0.35355338, %v241_v16  ;;  %v4833_v18 = vpop.f32.mrb[1].mxu1 }
 0x23c   :  { %v324_v19 = vsel %vm170_vm2, %v322_v17, -inf }
 0x23d   :  { %325 = vmax.xlane.f32.xlu1 %v324_v19  ;;  %v318_v20 = vpop.f32.mrb[2].mxu1 }
 0x23e   :  { %v323_v21 = vmul.f32 0.35355338, %v318_v20  ;;  %v4838_v22 = vpop.f32.mrb[3].mxu1 }
 0x23f   :  { %v164_v22 = vld [vmem:[%s6232_s3 + $0x8] sm:$0xff] }
 0x240   :  { %v327_v23 = vsel %vm170_vm2, %v323_v21, -inf }
 0x241   :  { %328 = vmax.xlane.f32.xlu1 %v327_v23  ;;  %v163_v23 = vld [vmem:[%s6232_s3] sm:$0xff] }
 0x252   :  { %346 = vrot.lane.b32.xlu1 %v5579_v12, %s6220_s4 }
 0x256   :  { %422 = vrot.lane.b32.xlu1 %v5583_v13, %s6220_s4 }
 0x25a   :  { %578 = vrot.lane.b32.xlu1 %v5583_v13, %s6216_s0 }
 0x2ca   :  { %v326_v24 = vpop.xlane.xlu1 %325 }
 0x2cb   :  { %v330_v25 = vsub.f32 %v322_v17, %v326_v24 }
 0x2cd   :  { %v332_v26 = vmul.f32 1.442695, %v330_v25 }
 0x2ce   :  { %v329_v27 = vpop.xlane.xlu1 %328 }
 0x2cf   :  { %5248 = vpow2.f32 %v332_v26  ;;  %v331_v28 = vsub.f32 %v323_v21, %v329_v27 }
 0x2d1   :  { %v334_v29 = vmul.f32 1.442695, %v331_v28 }
 0x2d2   :  { %v347_v30 = vpop.permute.xlu1 %346 }
 0x2d3   :  { %5250 = vpow2.f32 %v334_v29  ;;  %4840 = vmatpush3.msra.mxu1 %v347_v30 }
 0x2d4   :  { %4844 = vmatprep.subr.mxu1 %v5410_v8 }
 0x2d6   :  { %v423_v35 = vpop.permute.xlu1 %422 }
 0x2d9   :  { %v5249_v31 = vpop.eup %5248 }
 0x2da   :  { %v336_v32 = vsel %vm170_vm2, %v5249_v31, 0.0  ;;  %v579_v36 = vpop.permute.xlu1 %578 }
 0x2db   :  { %337 = vadd.xlane.f32.xlu0 %v336_v32 }
 0x2dd   :  { %v5251_v33 = vpop.eup %5250 }
 0x2de   :  { %v339_v34 = vsel %vm170_vm2, %v5251_v33, 0.0 }
 0x2df   :  { %340 = vadd.xlane.f32.xlu1 %v339_v34 }
 0x2f0   :  { %576 = vrot.lane.b32.xlu1 %v5583_v13, %s6218_s23 }
 0x2f1   :  { %500 = vrot.lane.b32.xlu0 %v5579_v12, %s6216_s0  ;;  %s6235_s0 = sld [smem:[#allocation15_spill]] }
 0x2f4   :  { %498 = vrot.lane.b32.xlu1 %v5579_v12, %s6218_s23  ;;  %s6238_s23 = smov 88  }
 0x368   :  { %v338_v37 = vpop.xlane.xlu0 %337 }
 0x369   :  { %5252 = vrcp.f32 %v338_v37 }
 0x36c   :  { %v341_v38 = vpop.xlane.xlu1 %340  ;;  %v501_v39 = vpop.permute.xlu0 %500 }
 0x36d   :  { %5254 = vrcp.f32 %v341_v38  ;;  %4850 = vmatpush3.xpose.msk.msra.mxu0 %vm170_vm2, %v501_v39 }
 0x36e   :  { %4859 = vmatprep.subr.mxu0 %v5410_v8 }
 0x370   :  { %v577_v40 = vpop.permute.xlu1 %576 }
 0x373   :  { %v5253_v41 = vpop.eup %5252 }
 0x374   :  { %v344_v42 = vmul.f32 %v5253_v41, %v5249_v31  ;;  %v499_v43 = vpop.permute.xlu1 %498 }
 0x375   :  { %4852 = vmatmul.mubr.msk.f32.vlgmr.msra.gmra.mrb[2].mxu0 %vm170_vm2, %v499_v43 }
 0x376   :  { %4842 = vmatmul.mubr.msk.f32.vlgmr.msra.gmra.mrb[4].mxu1 %vm170_vm2, %v344_v42  ;;  %4861 = vmatprep.mubr.msk.f32.mxu0 %vm5411_vm1, %v5410_v8 }
 0x377   :  { %v5255_v44 = vpop.eup %5254  ;;  %4845 = vmatpush3.msra.mxu1 %v423_v35  ;;  %4846 = vmatprep.mubr.msk.f32.mxu1 %vm5411_vm1, %v5410_v8 }
 0x378   :  { %v345_v45 = vmul.f32 %v5255_v44, %v5251_v33  ;;  %4854 = vmatprep.subr.mxu1 %v5410_v8 }
 0x37a   :  { %4847 = vmatmul.mubr.msk.f32.vlgmr.msra.gmra.mrb[6].mxu1 %vm170_vm2, %v345_v45 }
 0x37b   :  { %4856 = vmatprep.mubr.msk.f32.mxu1 %vm5411_vm1, %v5410_v8 }
 0x37e   :  { %4855 = vmatpush3.xpose.msk.msra.mxu1 %vm170_vm2, %v579_v36 }
 0x37f   :  { %4864 = vmatprep.subr.mxu1 %v5410_v8 }
 0x381   :  { %4857 = vmatmul.mubr.msk.f32.vlgmr.msra.gmra.mrb[8].mxu1 %vm170_vm2, %v577_v40 }
 0x382   :  { %4866 = vmatprep.mubr.msk.f32.mxu1 %vm5411_vm1, %v5410_v8 }
 0x448   :  { %v572_v46 = vpop.f32.mrb[2].mxu0 }
 0x449   :  { %v5633_v47 = vpop.f32.mrb[4].mxu1  ;;  %v4853_v48 = vpop.f32.mrb[3].mxu0  ;;  %v654_v56 = vmul.f32 0.35355338, %v572_v46 }
 0x44a   :  { %v4843_v49 = vpop.f32.mrb[5].mxu1  ;;  %v165_v48 = vld [vmem:[%s6232_s3 + $0x10] sm:$0xff] }
 0x44b   :  { %v656_v57 = vsel %vm170_vm2, %v654_v56, -inf }
 0x44d   :  { %v5635_v50 = vpop.f32.mrb[6].mxu1 }
 0x44e   :  { %v4848_v51 = vpop.f32.mrb[7].mxu1 }
 0x454   :  { %v650_v52 = vpop.f32.mrb[8].mxu1 }
 0x455   :  { %v655_v53 = vmul.f32 0.35355338, %v650_v52  ;;  %v4858_v54 = vpop.f32.mrb[9].mxu1 }
 0x457   :  { %v659_v55 = vsel %vm170_vm2, %v655_v53, -inf }
 0x458   :  { %660 = vmax.xlane.f32.xlu1 %v659_v55 }
 0x469   :  { %754 = vrot.lane.b32.xlu1 %v5583_v13, %s6212_s1 }
 0x46d   :  { %992 = vrot.lane.b32.xlu1 %v5579_v12, %s6204_s5 }
 0x471   :  { %1072 = vrot.lane.b32.xlu1 %v5583_v13, %s6214_s24 }
 0x475   :  { %1070 = vrot.lane.b32.xlu1 %v5583_v13, %s6204_s5 }
 0x499   :  { %657 = vmax.xlane.f32.xlu1 %v656_v57 }
 0x4e5   :  { %v661_v58 = vpop.xlane.xlu1 %660 }
 0x4e6   :  { %v663_v59 = vsub.f32 %v655_v53, %v661_v58 }
 0x4e8   :  { %v666_v60 = vmul.f32 1.442695, %v663_v59 }
 0x4e9   :  { %v755_v61 = vpop.permute.xlu1 %754 }
 0x4ea   :  { %5256 = vpow2.f32 %v666_v60  ;;  %4865 = vmatpush3.msra.mxu1 %v755_v61 }
 0x4eb   :  { %4879 = vmatprep.subr.mxu1 %v5410_v8 }
 0x4ed   :  { %v993_v0 = vpop.permute.xlu1 %992 }
 0x4f1   :  { %v1073_v1 = vpop.permute.xlu1 %1072 }
 0x4f4   :  { %v5257_v62 = vpop.eup %5256 }
 0x4f5   :  { %v671_v63 = vsel %vm170_vm2, %v5257_v62, 0.0  ;;  %v1071_v2 = vpop.permute.xlu1 %1070 }
 0x4f6   :  { %672 = vadd.xlane.f32.xlu0 %v671_v63 }
 0x50c   :  { %994 = vrot.lane.b32.xlu0 %v5579_v12, %s6214_s24  ;;  %s6241_s24 = smov 112  }
 0x526   :  { %v658_v3 = vpop.xlane.xlu1 %657 }
 0x527   :  { %v662_v4 = vsub.f32 %v654_v56, %v658_v3 }
 0x529   :  { %v664_v6 = vmul.f32 1.442695, %v662_v4 }
 0x52b   :  { %5258 = vpow2.f32 %v664_v6 }
 0x535   :  { %v5259_v9 = vpop.eup %5258 }
 0x536   :  { %v668_v10 = vsel %vm170_vm2, %v5259_v9, 0.0 }
 0x537   :  { %669 = vadd.xlane.f32.xlu0 %v668_v10 }
 0x54d   :  { %678 = vrot.lane.b32.xlu0 %v5579_v12, %s6212_s1  ;;  %s6240_s1 = smov 56  }
 0x551   :  { %1248 = vrot.lane.b32.xlu0 %v5583_v13, %s6210_s6 }
 0x555   :  { %1409 = vrot.lane.b32.xlu0 %v5579_v12, %s6202_s25 }
 0x559   :  { %1487 = vrot.lane.b32.xlu0 %v5583_v13, %s6202_s25  ;;  %s6239_s25 = smov 80  }
 0x55d   :  { %1407 = vrot.lane.b32.xlu0 %v5579_v12, %s6208_s26 }
 0x583   :  { %v673_v11 = vpop.xlane.xlu0 %672 }
 0x584   :  { %5260 = vrcp.f32 %v673_v11 }
 0x587   :  { %v995_v16 = vpop.permute.xlu0 %994 }
 0x58e   :  { %v5261_v14 = vpop.eup %5260 }
 0x58f   :  { %v677_v15 = vmul.f32 %v5261_v14, %v5257_v62 }
 0x591   :  { %4867 = vmatmul.mubr.msk.f32.vlgmr.msra.gmra.mrb[10].mxu1 %vm170_vm2, %v677_v15 }
 0x592   :  { %4880 = vmatpush3.xpose.msk.msra.mxu1 %vm170_vm2, %v995_v16  ;;  %4881 = vmatprep.mubr.msk.f32.mxu1 %vm5411_vm1, %v5410_v8 }
 0x593   :  { %4884 = vmatprep.subr.mxu1 %v5410_v8 }
 0x595   :  { %4882 = vmatmul.mubr.msk.f32.vlgmr.msra.gmra.mrb[12].mxu1 %vm170_vm2, %v993_v0 }
 0x596   :  { %4885 = vmatpush3.xpose.msk.msra.mxu1 %vm170_vm2, %v1073_v1  ;;  %4886 = vmatprep.mubr.msk.f32.mxu1 %vm5411_vm1, %v5410_v8 }
 0x597   :  { %4894 = vmatprep.subr.mxu1 %v5410_v8 }
 0x599   :  { %4887 = vmatmul.mubr.msk.f32.vlgmr.msra.gmra.mrb[14].mxu1 %vm170_vm2, %v1071_v2 }
 0x59a   :  { %4896 = vmatprep.mubr.msk.f32.mxu1 %vm5411_vm1, %v5410_v8 }
 0x5c4   :  { %v670_v17 = vpop.xlane.xlu0 %669 }
 0x5c5   :  { %5262 = vrcp.f32 %v670_v17 }
 0x5c8   :  { %v679_v18 = vpop.permute.xlu0 %678 }
 0x5c9   :  { %4860 = vmatpush3.msra.mxu0 %v679_v18 }
 0x5ca   :  { %4869 = vmatprep.subr.mxu0 %v164_v22 }
 0x5cc   :  { %v1249_v19 = vpop.permute.xlu0 %1248 }
 0x5cd   :  { %4895 = vmatpush3.msra.mxu1 %v1249_v19 }
 0x5ce   :  { %4904 = vmatprep.subr.mxu1 %v5410_v8 }
 0x5cf   :  { %v5263_v20 = vpop.eup %5262 }
 0x5d0   :  { %v676_v21 = vmul.f32 %v5263_v20, %v5259_v9 }
 0x5d2   :  { %4862 = vmatmul.mubr.msk.f32.vlgmr.msra.gmra.mrb[4].mxu0 %vm170_vm2, %v676_v21 }
 0x5d3   :  { %4870 = vmatpush3.msra.mxu0 %v164_v22 }
 0x5d4   :  { %4874 = vmatprep.subr.mxu0 %v163_v23 }
 0x664   :  { %v826_v24 = vpop.f32.mrb[10].mxu1 }
 0x665   :  { %v4868_v25 = vpop.f32.mrb[11].mxu1 }
 0x666   :  { %v166_v25 = vld [vmem:[%s6232_s3 + $0x18] sm:$0xff] }
 0x668   :  { %v1066_v26 = vpop.f32.mrb[12].mxu1 }
 0x669   :  { %v1148_v27 = vmul.f32 0.35355338, %v1066_v26  ;;  %v4883_v28 = vpop.f32.mrb[13].mxu1 }
 0x66b   :  { %v1150_v29 = vsel %vm170_vm2, %v1148_v27, -inf }
 0x66c   :  { %1151 = vmax.xlane.f32.xlu1 %v1150_v29  ;;  %v1144_v30 = vpop.f32.mrb[14].mxu1 }
 0x66d   :  { %v1149_v31 = vmul.f32 0.35355338, %v1144_v30  ;;  %v4888_v32 = vpop.f32.mrb[15].mxu1 }
 0x66e   :  { %v4578_v32 = vld [vmem:[%s6233_s27] ss:$0 sm:$0xff] }
 0x66f   :  { %v1153_v33 = vsel %vm170_vm2, %v1149_v31, -inf }
 0x670   :  { %1154 = vmax.xlane.f32.xlu1 %v1153_v33 }
 0x6a5   :  { %v750_v34 = vpop.f32.mrb[4].mxu0 }
 0x6a6   :  { %v4863_v35 = vpop.f32.mrb[5].mxu0  ;;  %4871 = vmatprep.mubr.msk.f32.mxu0 %vm170_vm2, %v750_v34 }
 0x6a7   :  { %4872 = vmatmul.mubr.msk.f32.vlgmr.msra.gmra.mrb[6].mxu0 %vm170_vm2, %v826_v24 }
 0x6a8   :  { %4876 = vmatprep.mubr.msk.f32.mxu0 %vm170_vm2, %v5633_v47  ;;  %4875 = vmatpush3.msra.mxu0 %v163_v23 }
 0x6a9   :  { %4889 = vmatprep.subr.mxu0 %v5410_v8 }
 0x6af   :  { %4877 = vmatmul.mubr.msk.f32.vlgmr.msra.gmra.mrb[6].mxu0 %vm170_vm2, %v5635_v50  ;;  %v1410_v50 = vpop.permute.xlu0 %1409 }
 0x6b0   :  { %4891 = vmatprep.mubr.msk.f32.mxu0 %vm5411_vm1, %v5410_v8 }
 0x6b3   :  { %v1488_v54 = vpop.permute.xlu0 %1487 }
 0x6b7   :  { %v1408_v56 = vpop.permute.xlu0 %1407 }
 0x6f9   :  { %v1152_v36 = vpop.xlane.xlu1 %1151 }
 0x6fa   :  { %v1156_v37 = vsub.f32 %v1148_v27, %v1152_v36 }
 0x6fc   :  { %v1158_v38 = vmul.f32 1.442695, %v1156_v37 }
 0x6fd   :  { %v1155_v39 = vpop.xlane.xlu1 %1154 }
 0x6fe   :  { %5264 = vpow2.f32 %v1158_v38  ;;  %v1157_v40 = vsub.f32 %v1149_v31, %v1155_v39 }
 0x700   :  { %v1160_v41 = vmul.f32 1.442695, %v1157_v40 }
 0x702   :  { %5266 = vpow2.f32 %v1160_v41 }
 0x708   :  { %v5265_v42 = vpop.eup %5264 }
 0x709   :  { %v1162_v43 = vsel %vm170_vm2, %v5265_v42, 0.0 }
 0x70a   :  { %1163 = vadd.xlane.f32.xlu1 %v1162_v43 }
 0x70c   :  { %v5267_v44 = vpop.eup %5266 }
 0x70d   :  { %v1165_v45 = vsel %vm170_vm2, %v5267_v44, 0.0 }
 0x70e   :  { %1166 = vadd.xlane.f32.xlu1 %v1165_v45 }
 0x71f   :  { %1172 = vrot.lane.b32.xlu1 %v5579_v12, %s6210_s6  ;;  %s6242_s6 = smov 48  }
 0x723   :  { %1485 = vrot.lane.b32.xlu1 %v5583_v13, %s6208_s26  ;;  %s6234_s26 = sld [smem:[#allocation14_spill]] }
 0x797   :  { %v1164_v46 = vpop.xlane.xlu1 %1163 }
 0x798   :  { %5268 = vrcp.f32 %v1164_v46 }
 0x79b   :  { %v1167_v47 = vpop.xlane.xlu1 %1166 }
 0x79c   :  { %5270 = vrcp.f32 %v1167_v47 }
 0x79f   :  { %v1173_v49 = vpop.permute.xlu1 %1172 }
 0x7a0   :  { %4890 = vmatpush3.msra.mxu0 %v1173_v49 }
 0x7a1   :  { %4899 = vmatprep.subr.mxu0 %v165_v48 }
 0x7a2   :  { %v5269_v51 = vpop.eup %5268 }
 0x7a3   :  { %v1170_v52 = vmul.f32 %v5269_v51, %v5265_v42  ;;  %v1486_v61 = vpop.permute.xlu1 %1485 }
 0x7a5   :  { %4892 = vmatmul.mubr.msk.f32.vlgmr.msra.gmra.mrb[8].mxu0 %vm170_vm2, %v1170_v52  ;;  %v1880_v52 = vld [vmem:[%s6181_s9 + $0x10] sm:$0xff] }
 0x7a6   :  { %v5271_v53 = vpop.eup %5270  ;;  %4900 = vmatpush3.msra.mxu0 %v165_v48 }
 0x7a7   :  { %v1171_v55 = vmul.f32 %v5271_v53, %v5267_v44  ;;  %4909 = vmatprep.subr.mxu0 %v5410_v8  ;;  %v1881_v53 = vld [vmem:[%s6181_s9 + $0x18] sm:$0xff] }
 0x7a9   :  { %4897 = vmatmul.mubr.msk.f32.vlgmr.msra.gmra.mrb[16].mxu1 %vm170_vm2, %v1171_v55  ;;  %v1972_v55 = vld [vmem:[%s6183_s11] sm:$0xff] }
 0x7aa   :  { %4905 = vmatpush3.xpose.msk.msra.mxu1 %vm170_vm2, %v1410_v50  ;;  %4906 = vmatprep.mubr.msk.f32.mxu1 %vm5411_vm1, %v5410_v8  ;;  %v1879_v50 = vld [vmem:[%s6181_s9 + $0x8] sm:$0xff] }
 0x7ab   :  { %4914 = vmatprep.subr.mxu1 %v5410_v8 }
 0x7ad   :  { %4907 = vmatmul.mubr.msk.f32.vlgmr.msra.gmra.mrb[18].mxu1 %vm170_vm2, %v1408_v56  ;;  %v1973_v56 = vld [vmem:[%s6183_s11 + $0x8] sm:$0xff] }
 0x7ae   :  { %4916 = vmatprep.mubr.msk.f32.mxu1 %vm5411_vm1, %v5410_v8 }
 0x878   :  { %v1244_v57 = vpop.f32.mrb[8].mxu0 }
 0x879   :  { %v4893_v58 = vpop.f32.mrb[9].mxu0  ;;  %4901 = vmatprep.mubr.msk.f32.mxu0 %vm170_vm2, %v1244_v57  ;;  %v1974_v57 = vld [vmem:[%s6183_s11 + $0x10] sm:$0xff] }
 0x87a   :  { %v5149_v58 = vpack.c.bf16 %v1973_v56, %v1972_v55 }
 0x87c   :  { %v1320_v59 = vpop.f32.mrb[16].mxu1 }
 0x87d   :  { %v4898_v60 = vpop.f32.mrb[17].mxu1  ;;  %4902 = vmatmul.mubr.msk.f32.vlgmr.msra.gmra.mrb[6].mxu0 %vm170_vm2, %v1320_v59  ;;  %v1975_v59 = vld [vmem:[%s6183_s11 + $0x18] sm:$0xff] }
 0x87e   :  { %4910 = vmatpush3.xpose.msk.msra.mxu0 %vm170_vm2, %v1488_v54  ;;  %4911 = vmatprep.mubr.msk.f32.mxu0 %vm5411_vm1, %v5410_v8  ;;  %v5145_v54 = vpack.c.bf16 %v1881_v53, %v1880_v52  ;;  %v5153_v60 = vpack.c.bf16 %v1975_v59, %v1974_v57  ;;  %v4587_v59 = vld [vmem:[%s6179_s7] ss:$0 sm:$0xff] }
 0x87f   :  { %4919 = vmatprep.subr.mxu0 %v5410_v8 }
 0x880   :  { %v1481_v62 = vpop.f32.mrb[18].mxu1 }
 0x881   :  { %v1563_v63 = vmul.f32 0.35355338, %v1481_v62  ;;  %v4908_v0 = vpop.f32.mrb[19].mxu1  ;;  %4912 = vmatmul.mubr.msk.f32.vlgmr.msra.gmra.mrb[10].mxu0 %vm170_vm2, %v1486_v61  ;;  %v1976_v61 = vld [vmem:[%s6183_s11 + $0x20] sm:$0xff]  ;;  %v1977_v62 = vld [vmem:[%s6183_s11 + $0x28] sm:$0xff] }
 0x882   :  { %4921 = vmatprep.mubr.msk.f32.mxu0 %vm5411_vm1, %v5410_v8 }
 0x883   :  { %v1565_v1 = vsel %vm170_vm2, %v1563_v63, -inf }
 0x884   :  { %1566 = vmax.xlane.f32.xlu0 %v1565_v1 }
 0x911   :  { %v1567_v2 = vpop.xlane.xlu0 %1566 }
 0x912   :  { %v1571_v3 = vsub.f32 %v1563_v63, %v1567_v2  ;;  %v5157_v63 = vpack.c.bf16 %v1977_v62, %v1976_v61 }
 0x914   :  { %v1573_v4 = vmul.f32 1.442695, %v1571_v3 }
 0x916   :  { %5272 = vpow2.f32 %v1573_v4 }
 0x920   :  { %v5273_v6 = vpop.eup %5272 }
 0x921   :  { %v1577_v9 = vsel %vm170_vm2, %v5273_v6, 0.0 }
 0x922   :  { %1578 = vadd.xlane.f32.xlu0 %v1577_v9 }
 0x954   :  { %v1559_v10 = vpop.f32.mrb[10].mxu0 }
 0x955   :  { %v1564_v11 = vmul.f32 0.35355338, %v1559_v10  ;;  %v4913_v14 = vpop.f32.mrb[11].mxu0  ;;  %v4579_v10 = vld [vmem:[%s6234_s26] ss:$0 sm:$0xff] }
 0x957   :  { %v1568_v15 = vsel %vm170_vm2, %v1564_v11, -inf }
 0x958   :  { %1569 = vmax.xlane.f32.xlu1 %v1568_v15 }
 0x969   :  { %1587 = vrot.lane.b32.xlu1 %v5579_v12, %s6206_s2 }
 0x9af   :  { %v1579_v16 = vpop.xlane.xlu0 %1578 }
 0x9b0   :  { %5274 = vrcp.f32 %v1579_v16  ;;  %v4580_v16 = vld [vmem:[%s6235_s0] ss:$0 sm:$0xff] }
 0x9ba   :  { %v5275_v18 = vpop.eup %5274 }
 0x9bb   :  { %v1585_v21 = vmul.f32 %v5275_v18, %v5273_v6 }
 0x9e5   :  { %v1570_v17 = vpop.xlane.xlu1 %1569 }
 0x9e6   :  { %v1572_v19 = vsub.f32 %v1564_v11, %v1570_v17 }
 0x9e8   :  { %v1575_v20 = vmul.f32 1.442695, %v1572_v19 }
 0x9e9   :  { %v1588_v22 = vpop.permute.xlu1 %1587 }
 0x9ea   :  { %5276 = vpow2.f32 %v1575_v20  ;;  %4915 = vmatpush3.msra.mxu1 %v1588_v22  ;;  %v1979_v22 = vld [vmem:[%s6183_s11 + $0x38] sm:$0xff] }
 0x9eb   :  { %4917 = vmatmul.mubr.msk.f32.vlgmr.msra.gmra.mrb[20].mxu1 %vm170_vm2, %v1585_v21  ;;  %v1978_v21 = vld [vmem:[%s6183_s11 + $0x30] sm:$0xff] }
 0x9f4   :  { %v5277_v23 = vpop.eup %5276 }
 0x9f5   :  { %v1580_v24 = vsel %vm170_vm2, %v5277_v23, 0.0 }
 0x9f6   :  { %1581 = vadd.xlane.f32.xlu0 %v1580_v24  ;;  %v4581_v24 = vld [vmem:[%s6182_s10] ss:$0 sm:$0xff] }
 0xa0c   :  { %1663 = vrot.lane.b32.xlu0 %v5583_v13, %s6206_s2  ;;  %s6244_s2 = smov 104  }
 0xa83   :  { %v1582_v12 = vpop.xlane.xlu0 %1581 }
 0xa84   :  { %5278 = vrcp.f32 %v1582_v12 }
 0xa87   :  { %v1664_v26 = vpop.permute.xlu0 %1663 }
 0xa88   :  { %4920 = vmatpush3.msra.mxu0 %v1664_v26 }
 0xa89   :  { %4924 = vmatprep.subr.mxu0 %v166_v25 }
 0xa8e   :  { %v5279_v27 = vpop.eup %5278 }
 0xa8f   :  { %v1586_v28 = vmul.f32 %v5279_v27, %v5277_v23  ;;  %v5161_v23 = vpack.c.bf16 %v1979_v22, %v1978_v21 }
 0xa91   :  { %4922 = vmatmul.mubr.msk.f32.vlgmr.msra.gmra.mrb[12].mxu0 %vm170_vm2, %v1586_v28 }
 0xa92   :  { %4925 = vmatpush3.msra.mxu0 %v166_v25 }
 0xa93   :  { %5150 = vmatprep.subr.bf16.mxu0 %v5149_v58 }
 0xabe   :  { %v1659_v29 = vpop.f32.mrb[20].mxu1 }
 0xabf   :  { %v4918_v30 = vpop.f32.mrb[21].mxu1  ;;  %4926 = vmatprep.mubr.msk.f32.mxu0 %vm170_vm2, %v1659_v29 }
 0xac0   :  { %v4584_v30 = vld [vmem:[%s6184_s12] ss:$0 sm:$0xff] }
 0xb64   :  { %v1735_v31 = vpop.f32.mrb[12].mxu0 }
 0xb65   :  { %v4923_v13 = vpop.f32.mrb[13].mxu0  ;;  %4927 = vmatmul.mubr.msk.f32.vlgmr.msra.gmra.mrb[6].mxu0 %vm170_vm2, %v1735_v31 }
 0xb66   :  { %5152 = vmatpush3.bf16.msra.mxu0 %v5149_v58 }
 0xb67   :  { %5154 = vmatprep.subr.bf16.mxu0 %v5153_v60 }
 0xb6a   :  { %5156 = vmatpush3.bf16.msra.mxu0 %v5153_v60 }
 0xb6b   :  { %5158 = vmatprep.subr.bf16.mxu0 %v5157_v63 }
 0xb6e   :  { %5160 = vmatpush3.bf16.msra.mxu0 %v5157_v63  ;;  %v4588_v63 = vld [vmem:[%s6180_s8] ss:$0 sm:$0xff] }
 0xb6f   :  { %5162 = vmatprep.subr.bf16.mxu0 %v5161_v23 }
 0xb72   :  { %5164 = vmatpush3.bf16.msra.mxu0 %v5161_v23 }
 0xb73   :  { %4980 = vmatprep.subr.mxu0 %v5410_v8 }
 0xc38   :  { %v4928_v33 = vpop.f32.mrb[6].mxu0 }
 0xc39   :  { %v1830_v34 = vadd.f32 %v4928_v33, %v4578_v32  ;;  %v1811_v35 = vpop.f32.mrb[7].mxu0 }
 0xc3a   :  { %v1829_v36 = vadd.f32 %v4578_v32, %v1811_v35 }
 0xc3b   :  { %v1832_v37 = vadd.f32 %v1830_v34, %v5566_v7 }
 0xc3c   :  { %v1831_v38 = vadd.f32 %v1829_v36, %v5559_v5  ;;  %v1878_v5 = vld [vmem:[%s6181_s9] sm:$0xff] }
 0xc3d   :  { %v1838_v39 = vsel %vm81_vm0, %v1832_v37, 0.0  ;;  %v5141_v51 = vpack.c.bf16 %v1879_v50, %v1878_v5  ;;  %v4591_v5 = vld [vmem:[%s6229_s29 + $0x30] sm:$0xff]  ;;  %v4592_v50 = vld [vmem:[%s6229_s29 + $0x38] sm:$0xff] }
 0xc3e   :  { %1839 = vadd.xlane.f32.xlu0 %v1838_v39  ;;  %v1835_v40 = vsel %vm81_vm0, %v1831_v38, 0.0 }
 0xc3f   :  { %1836 = vadd.xlane.f32.xlu1 %v1835_v40  ;;  %5142 = vmatprep.subr.bf16.mxu1 %v5141_v51 }
 0xc40   :  { %5144 = vmatpush3.bf16.msra.mxu1 %v5141_v51  ;;  %v5169_v51 = vpack.c.bf16 %v4592_v50, %v4591_v5 }
 0xc41   :  { %5146 = vmatprep.subr.bf16.mxu1 %v5145_v54 }
 0xc44   :  { %5148 = vmatpush3.bf16.msra.mxu1 %v5145_v54 }
 0xccb   :  { %v1840_v41 = vpop.xlane.xlu0 %1839 }
 0xccc   :  { %v1843_v42 = vmul.f32 0.03125, %v1840_v41  ;;  %v1837_v43 = vpop.xlane.xlu1 %1836 }
 0xccd   :  { %v1842_v44 = vmul.f32 0.03125, %v1837_v43 }
 0xcce   :  { %v1845_v45 = vsub.f32 %v1832_v37, %v1843_v42 }
 0xccf   :  { %v1844_v46 = vsub.f32 %v1831_v38, %v1842_v44 }
 0xcd0   :  { %v1847_v47 = vmul.f32 %v1845_v45, %v1845_v45 }
 0xcd1   :  { %v1846_v48 = vmul.f32 %v1844_v46, %v1844_v46 }
 0xcd2   :  { %v1851_v49 = vsel %vm81_vm0, %v1847_v47, 0.0 }
 0xcd3   :  { %1852 = vadd.xlane.f32.xlu0 %v1851_v49  ;;  %v1848_v7 = vsel %vm81_vm0, %v1846_v48, 0.0  ;;  %v4589_v48 = vld [vmem:[%s6229_s29 + $0x20] sm:$0xff]  ;;  %v4590_v49 = vld [vmem:[%s6229_s29 + $0x28] sm:$0xff]  ;;  %s6243_s29 = smov 72  }
 0xcd4   :  { %1849 = vadd.xlane.f32.xlu1 %v1848_v7  ;;  %v5165_v7 = vpack.c.bf16 %v4590_v49, %v4589_v48 }
 0xcd6   :  { %5166 = vmatprep.subr.bf16.mxu1 %v5165_v7 }
 0xd60   :  { %v1853_v0 = vpop.xlane.xlu0 %1852 }
 0xd61   :  { %v1855_v1 = vmul.f32 0.03125, %v1853_v0  ;;  %v1850_v2 = vpop.xlane.xlu1 %1849 }
 0xd62   :  { %v1854_v3 = vmul.f32 0.03125, %v1850_v2 }
 0xd63   :  { %v1857_v4 = vadd.f32 1e-05, %v1855_v1 }
 0xd64   :  { %v1856_v6 = vadd.f32 1e-05, %v1854_v3 }
 0xd65   :  { %5280 = vrsqrt.f32 %v1857_v4  ;;  %v4594_v4 = vld [vmem:[%s6231_s28 + $0x1] ss:$0 sm:$0xff]  ;;  %s6236_s28 = smov 64  }
 0xd66   :  { %5282 = vrsqrt.f32 %v1856_v6 }
 0xd6f   :  { %v5281_v9 = vpop.eup %5280 }
 0xd70   :  { %v5283_v11 = vpop.eup %5282  ;;  %v1861_v14 = vmul.f32 %v5281_v9, %v1845_v45 }
 0xd71   :  { %v1860_v15 = vmul.f32 %v5283_v11, %v1844_v46 }
 0xd72   :  { %v1869_v17 = vmul.f32 %v4579_v10, %v1861_v14 }
 0xd73   :  { %v1868_v18 = vmul.f32 %v4579_v10, %v1860_v15 }
 0xd74   :  { %v1877_v20 = vadd.f32 %v4580_v16, %v1869_v17 }
 0xd75   :  { %v1876_v19 = vadd.f32 %v4580_v16, %v1868_v18 }
 0xd77   :  { %4937 = vmatprep.mubr.msk.f32.mxu1 %vm81_vm0, %v1876_v19 }
 0xd78   :  { %4938 = vmatmul.mubr.msk.f32.vlgmr.msra.gmra.mrb[22].mxu1 %vm81_vm0, %v1877_v20 }
 0xd79   :  { %5168 = vmatpush3.bf16.msra.mxu1 %v5165_v7 }
 0xd7a   :  { %5170 = vmatprep.subr.bf16.mxu1 %v5169_v51 }
 0xd7d   :  { %5172 = vmatpush3.bf16.msra.mxu1 %v5169_v51 }
 0xd7e   :  { %4970 = vmatprep.subr.mxu1 %v5410_v8 }
 0xe4b   :  { %v4939_v12 = vpop.f32.mrb[22].mxu1 }
 0xe4c   :  { %v1967_v25 = vadd.f32 %v4939_v12, %v4581_v24  ;;  %v1961_v26 = vpop.f32.mrb[23].mxu1 }
 0xe4d   :  { %v1962_v27 = vadd.f32 %v4581_v24, %v1961_v26 }
 0xe4e   :  { %v1971_v29 = vmax.f32 %v1967_v25, 0.0 }
 0xe4f   :  { %v1970_v28 = vmax.f32 %v1962_v27, 0.0 }
 0xe51   :  { %4956 = vmatprep.mubr.msk.f32.mxu0 %vm1987_vm3, %v1970_v28 }
 0xe52   :  { %4957 = vmatmul.mubr.msk.f32.vlgmr.msra.gmra.mrb[14].mxu0 %vm1987_vm3, %v1971_v29 }
 0xe53   :  { %4982 = vmatprep.mubr.msk.f32.mxu0 %vm5411_vm1, %v5410_v8 }
 0xf25   :  { %v4958_v31 = vpop.f32.mrb[14].mxu0 }
 0xf26   :  { %v2066_v13 = vadd.f32 %v4958_v31, %v4584_v30  ;;  %v2060_v32 = vpop.f32.mrb[15].mxu0 }
 0xf27   :  { %v2061_v33 = vadd.f32 %v4584_v30, %v2060_v32 }
 0xf28   :  { %v2070_v34 = vadd.f32 %v2066_v13, %v1877_v20 }
 0xf29   :  { %v2069_v35 = vadd.f32 %v2061_v33, %v1876_v19 }
 0xf2a   :  { %v2076_v36 = vsel %vm81_vm0, %v2070_v34, 0.0 }
 0xf2b   :  { %2077 = vadd.xlane.f32.xlu0 %v2076_v36  ;;  %v2073_v37 = vsel %vm81_vm0, %v2069_v35, 0.0 }
 0xf2c   :  { %2074 = vadd.xlane.f32.xlu1 %v2073_v37 }
 0xfb8   :  { %v2078_v38 = vpop.xlane.xlu0 %2077 }
 0xfb9   :  { %v2080_v39 = vmul.f32 0.03125, %v2078_v38  ;;  %v2075_v40 = vpop.xlane.xlu1 %2074 }
 0xfba   :  { %v2079_v41 = vmul.f32 0.03125, %v2075_v40 }
 0xfbb   :  { %v2082_v42 = vsub.f32 %v2070_v34, %v2080_v39 }
 0xfbc   :  { %v2081_v43 = vsub.f32 %v2069_v35, %v2079_v41 }
 0xfbd   :  { %v2084_v44 = vmul.f32 %v2082_v42, %v2082_v42 }
 0xfbe   :  { %v2083_v45 = vmul.f32 %v2081_v43, %v2081_v43 }
 0xfbf   :  { %v2088_v46 = vsel %vm81_vm0, %v2084_v44, 0.0 }
 0xfc0   :  { %2089 = vadd.xlane.f32.xlu0 %v2088_v46  ;;  %v2085_v47 = vsel %vm81_vm0, %v2083_v45, 0.0 }
 0xfc1   :  { %2086 = vadd.xlane.f32.xlu1 %v2085_v47 }
0x104d   :  { %v2090_v52 = vpop.xlane.xlu0 %2089 }
0x104e   :  { %v2092_v53 = vmul.f32 0.03125, %v2090_v52  ;;  %v2087_v54 = vpop.xlane.xlu1 %2086 }
0x104f   :  { %v2091_v55 = vmul.f32 0.03125, %v2087_v54 }
0x1050   :  { %v2094_v56 = vadd.f32 1e-05, %v2092_v53 }
0x1051   :  { %v2093_v57 = vadd.f32 1e-05, %v2091_v55 }
0x1052   :  { %5284 = vrsqrt.f32 %v2094_v56 }
0x1053   :  { %5286 = vrsqrt.f32 %v2093_v57 }
0x105c   :  { %v5285_v58 = vpop.eup %5284 }
0x105d   :  { %v5287_v60 = vpop.eup %5286  ;;  %v2098_v61 = vmul.f32 %v5285_v58, %v2082_v42 }
0x105e   :  { %v2097_v62 = vmul.f32 %v5287_v60, %v2081_v43 }
0x105f   :  { %v2106_v0 = vmul.f32 %v4587_v59, %v2098_v61 }
0x1060   :  { %v2105_v1 = vmul.f32 %v4587_v59, %v2097_v62 }
0x1061   :  { %v5826_v3 = vadd.f32 %v4588_v63, %v2106_v0 }
0x1062   :  { %v5824_v2 = vadd.f32 %v4588_v63, %v2105_v1 }
0x1064   :  { %4967 = vmatprep.mubr.msk.f32.mxu1 %vm81_vm0, %v5824_v2 }
0x1065   :  { %4968 = vmatmul.mubr.msk.f32.vlgmr.msra.gmra.mrb[24].mxu1 %vm81_vm0, %v5826_v3 }
0x1066   :  { %4972 = vmatprep.mubr.msk.f32.mxu1 %vm5411_vm1, %v5410_v8 }
0x1138   :  { %v4969_v6 = vpop.f32.mrb[24].mxu1 }
0x1139   :  { %v5837_v9 = vadd.f32 %v4969_v6, %v4594_v4  ;;  %v2200_v10 = vpop.f32.mrb[25].mxu1 }
0x113a   :  { %v5839_v11 = vadd.f32 %v4594_v4, %v2200_v10 }
0x113b   :  { %2292 = vrot.lane.b32.xlu0 %v5837_v9, %s5412_s30 }
0x113c   :  { %2215 = vrot.lane.b32.xlu1 %v5839_v11, %s5412_s30  ;;  %s6237_s30 = smov 120  }
0x11ad   :  { %v2293_v15 = vpop.permute.xlu0 %2292 }
0x11ae   :  { %v2216_v14 = vpop.permute.xlu1 %2215 }
0x11af   :  { %4971 = vmatpush3.xpose.msk.msra.mxu1 %vm170_vm2, %v2216_v14 }
0x11b0   :  { %4975 = vmatprep.subr.mxu1 %v5410_v8 }
0x11b2   :  { %4973 = vmatmul.mubr.msk.f32.vlgmr.msra.gmra.mrb[26].mxu1 %vm170_vm2, %v5839_v11 }
0x11b3   :  { %4976 = vmatpush3.xpose.msk.msra.mxu1 %vm170_vm2, %v2293_v15  ;;  %4977 = vmatprep.mubr.msk.f32.mxu1 %vm5411_vm1, %v5410_v8 }
0x11b4   :  { %4985 = vmatprep.subr.mxu1 %v5410_v8 }
0x11b6   :  { %4978 = vmatmul.mubr.msk.f32.vlgmr.msra.gmra.mrb[28].mxu1 %vm170_vm2, %v5837_v9 }
0x11b7   :  { %4987 = vmatprep.mubr.msk.f32.mxu1 %vm5411_vm1, %v5410_v8 }
0x1285   :  { %v2287_v16 = vpop.f32.mrb[26].mxu1 }
0x1286   :  { %v4974_v17 = vpop.f32.mrb[27].mxu1  ;;  %v2368_v22 = vmul.f32 0.35355338, %v2287_v16 }
0x1288   :  { %v2370_v23 = vsel %vm170_vm2, %v2368_v22, -inf }
0x1289   :  { %v2364_v18 = vpop.f32.mrb[28].mxu1 }
0x128a   :  { %v2369_v19 = vmul.f32 0.35355338, %v2364_v18  ;;  %v4979_v20 = vpop.f32.mrb[29].mxu1 }
0x128c   :  { %v2373_v21 = vsel %vm170_vm2, %v2369_v19, -inf }
0x128d   :  { %2374 = vmax.xlane.f32.xlu1 %v2373_v21 }
0x129e   :  { %2468 = vrot.lane.b32.xlu1 %v5837_v9, %s6236_s28 }
0x12a2   :  { %2622 = vrot.lane.b32.xlu1 %v5837_v9, %s6237_s30 }
0x12c6   :  { %2371 = vmax.xlane.f32.xlu1 %v2370_v23 }
0x12d7   :  { %2546 = vrot.lane.b32.xlu1 %v5839_v11, %s6238_s23 }
0x12db   :  { %2544 = vrot.lane.b32.xlu1 %v5839_v11, %s6237_s30 }
0x12df   :  { %3040 = vrot.lane.b32.xlu1 %v5839_v11, %s6239_s25 }
0x131a   :  { %v2375_v24 = vpop.xlane.xlu1 %2374 }
0x131b   :  { %v2377_v12 = vsub.f32 %v2369_v19, %v2375_v24 }
0x131d   :  { %v2380_v25 = vmul.f32 1.442695, %v2377_v12 }
0x131e   :  { %v2469_v26 = vpop.permute.xlu1 %2468 }
0x131f   :  { %5288 = vpow2.f32 %v2380_v25  ;;  %4986 = vmatpush3.msra.mxu1 %v2469_v26 }
0x1320   :  { %4995 = vmatprep.subr.mxu1 %v5410_v8 }
0x1322   :  { %v2623_v29 = vpop.permute.xlu1 %2622 }
0x1329   :  { %v5289_v27 = vpop.eup %5288 }
0x132a   :  { %v2385_v28 = vsel %vm170_vm2, %v5289_v27, 0.0 }
0x132b   :  { %2386 = vadd.xlane.f32.xlu0 %v2385_v28 }
0x1341   :  { %2624 = vrot.lane.b32.xlu0 %v5837_v9, %s6238_s23 }
0x1353   :  { %v2372_v30 = vpop.xlane.xlu1 %2371 }
0x1354   :  { %v2376_v31 = vsub.f32 %v2368_v22, %v2372_v30 }
0x1356   :  { %v2378_v13 = vmul.f32 1.442695, %v2376_v31  ;;  %v4598_v31 = vld [vmem:[%s6232_s3 + $0x28] sm:$0xff] }
0x1357   :  { %v2547_v41 = vpop.permute.xlu1 %2546 }
0x1358   :  { %5290 = vpow2.f32 %v2378_v13  ;;  %v4597_v13 = vld [vmem:[%s6232_s3 + $0x20] sm:$0xff] }
0x135b   :  { %v2545_v43 = vpop.permute.xlu1 %2544 }
0x135f   :  { %v3041_v60 = vpop.permute.xlu1 %3040 }
0x1362   :  { %v5291_v32 = vpop.eup %5290 }
0x1363   :  { %v2382_v33 = vsel %vm170_vm2, %v5291_v32, 0.0 }
0x1364   :  { %2383 = vadd.xlane.f32.xlu0 %v2382_v33 }
0x137a   :  { %2392 = vrot.lane.b32.xlu0 %v5839_v11, %s6236_s28 }
0x13b8   :  { %v2387_v34 = vpop.xlane.xlu0 %2386 }
0x13b9   :  { %5292 = vrcp.f32 %v2387_v34 }
0x13bc   :  { %v2625_v37 = vpop.permute.xlu0 %2624 }
0x13c3   :  { %v5293_v35 = vpop.eup %5292 }
0x13c4   :  { %v2391_v36 = vmul.f32 %v5293_v35, %v5289_v27 }
0x13c6   :  { %4988 = vmatmul.mubr.msk.f32.vlgmr.msra.gmra.mrb[30].mxu1 %vm170_vm2, %v2391_v36 }
0x13c7   :  { %4996 = vmatpush3.xpose.msk.msra.mxu1 %vm170_vm2, %v2625_v37  ;;  %4997 = vmatprep.mubr.msk.f32.mxu1 %vm5411_vm1, %v5410_v8 }
0x13c8   :  { %5005 = vmatprep.subr.mxu1 %v5410_v8 }
0x13ca   :  { %4998 = vmatmul.mubr.msk.f32.vlgmr.msra.gmra.mrb[32].mxu1 %vm170_vm2, %v2623_v29 }
0x13cb   :  { %5007 = vmatprep.mubr.msk.f32.mxu1 %vm5411_vm1, %v5410_v8 }
0x13f1   :  { %v2384_v38 = vpop.xlane.xlu0 %2383 }
0x13f2   :  { %5294 = vrcp.f32 %v2384_v38 }
0x13f5   :  { %v2393_v39 = vpop.permute.xlu0 %2392 }
0x13f6   :  { %4981 = vmatpush3.msra.mxu0 %v2393_v39 }
0x13f7   :  { %4990 = vmatprep.subr.mxu0 %v5410_v8 }
0x13fc   :  { %v5295_v40 = vpop.eup %5294 }
0x13fd   :  { %v2390_v42 = vmul.f32 %v5295_v40, %v5291_v32 }
0x13ff   :  { %4983 = vmatmul.mubr.msk.f32.vlgmr.msra.gmra.mrb[16].mxu0 %vm170_vm2, %v2390_v42 }
0x1400   :  { %4991 = vmatpush3.xpose.msk.msra.mxu0 %vm170_vm2, %v2547_v41  ;;  %4992 = vmatprep.mubr.msk.f32.mxu0 %vm5411_vm1, %v5410_v8 }
0x1401   :  { %5000 = vmatprep.subr.mxu0 %v5410_v8 }
0x1403   :  { %4993 = vmatmul.mubr.msk.f32.vlgmr.msra.gmra.mrb[18].mxu0 %vm170_vm2, %v2545_v43 }
0x1404   :  { %5002 = vmatprep.mubr.msk.f32.mxu0 %vm5411_vm1, %v5410_v8 }
0x1499   :  { %v5893_v44 = vpop.f32.mrb[30].mxu1 }
0x149a   :  { %v4989_v45 = vpop.f32.mrb[31].mxu1 }
0x149d   :  { %v2696_v46 = vpop.f32.mrb[32].mxu1 }
0x149e   :  { %v2701_v47 = vmul.f32 0.35355338, %v2696_v46  ;;  %v4999_v48 = vpop.f32.mrb[33].mxu1 }
0x14a0   :  { %v2705_v49 = vsel %vm170_vm2, %v2701_v47, -inf }
0x14a1   :  { %2706 = vmax.xlane.f32.xlu0 %v2705_v49 }
0x14b7   :  { %2800 = vrot.lane.b32.xlu0 %v5837_v9, %s6240_s1 }
0x14bb   :  { %3038 = vrot.lane.b32.xlu0 %v5839_v11, %s6241_s24 }
0x14bf   :  { %3116 = vrot.lane.b32.xlu0 %v5837_v9, %s6241_s24 }
0x14d2   :  { %v5902_v7 = vpop.f32.mrb[16].mxu0 }
0x14d3   :  { %v4984_v5 = vpop.f32.mrb[17].mxu0 }
0x14d6   :  { %v2618_v50 = vpop.f32.mrb[18].mxu0 }
0x14d7   :  { %v4994_v51 = vpop.f32.mrb[19].mxu0  ;;  %v2700_v58 = vmul.f32 0.35355338, %v2618_v50 }
0x14d9   :  { %v2702_v59 = vsel %vm170_vm2, %v2700_v58, -inf }
0x152e   :  { %v2707_v52 = vpop.xlane.xlu0 %2706 }
0x152f   :  { %v2709_v53 = vsub.f32 %v2701_v47, %v2707_v52  ;;  %v4599_v47 = vld [vmem:[%s6232_s3 + $0x30] sm:$0xff] }
0x1531   :  { %v2712_v54 = vmul.f32 1.442695, %v2709_v53 }
0x1532   :  { %v2801_v55 = vpop.permute.xlu0 %2800 }
0x1533   :  { %5296 = vpow2.f32 %v2712_v54  ;;  %5006 = vmatpush3.msra.mxu1 %v2801_v55 }
0x1534   :  { %5020 = vmatprep.subr.mxu1 %v5410_v8 }
0x1536   :  { %v3039_v0 = vpop.permute.xlu0 %3038 }
0x153a   :  { %v3117_v4 = vpop.permute.xlu0 %3116 }
0x153d   :  { %v5297_v56 = vpop.eup %5296 }
0x153e   :  { %v2717_v57 = vsel %vm170_vm2, %v5297_v56, 0.0 }
0x153f   :  { %2718 = vadd.xlane.f32.xlu1 %v2717_v57 }
0x1550   :  { %3118 = vrot.lane.b32.xlu1 %v5837_v9, %s6239_s25 }
0x1574   :  { %2703 = vmax.xlane.f32.xlu1 %v2702_v59 }
0x15cc   :  { %v2719_v61 = vpop.xlane.xlu1 %2718 }
0x15cd   :  { %5298 = vrcp.f32 %v2719_v61 }
0x15d0   :  { %v3119_v1 = vpop.permute.xlu1 %3118 }
0x15d7   :  { %v5299_v62 = vpop.eup %5298 }
0x15d8   :  { %v2723_v63 = vmul.f32 %v5299_v62, %v5297_v56 }
0x15da   :  { %5008 = vmatmul.mubr.msk.f32.vlgmr.msra.gmra.mrb[34].mxu1 %vm170_vm2, %v2723_v63 }
0x15db   :  { %5021 = vmatpush3.xpose.msk.msra.mxu1 %vm170_vm2, %v3041_v60  ;;  %5022 = vmatprep.mubr.msk.f32.mxu1 %vm5411_vm1, %v5410_v8 }
0x15dc   :  { %5025 = vmatprep.subr.mxu1 %v5410_v8 }
0x15de   :  { %5023 = vmatmul.mubr.msk.f32.vlgmr.msra.gmra.mrb[36].mxu1 %vm170_vm2, %v3039_v0 }
0x15df   :  { %5026 = vmatpush3.xpose.msk.msra.mxu1 %vm170_vm2, %v3119_v1  ;;  %5027 = vmatprep.mubr.msk.f32.mxu1 %vm5411_vm1, %v5410_v8 }
0x15e0   :  { %5035 = vmatprep.subr.mxu1 %v5410_v8 }
0x15e2   :  { %5028 = vmatmul.mubr.msk.f32.vlgmr.msra.gmra.mrb[38].mxu1 %vm170_vm2, %v3117_v4 }
0x15e3   :  { %5037 = vmatprep.mubr.msk.f32.mxu1 %vm5411_vm1, %v5410_v8 }
0x1601   :  { %v2704_v6 = vpop.xlane.xlu1 %2703 }
0x1602   :  { %v2708_v10 = vsub.f32 %v2700_v58, %v2704_v6 }
0x1604   :  { %v2710_v14 = vmul.f32 1.442695, %v2708_v10 }
0x1606   :  { %5300 = vpow2.f32 %v2710_v14 }
0x1610   :  { %v5301_v15 = vpop.eup %5300 }
0x1611   :  { %v2714_v16 = vsel %vm170_vm2, %v5301_v15, 0.0 }
0x1612   :  { %2715 = vadd.xlane.f32.xlu0 %v2714_v16 }
0x1628   :  { %2724 = vrot.lane.b32.xlu0 %v5839_v11, %s6240_s1  ;;  %s6245_s1 = smov 40  }
0x162c   :  { %3294 = vrot.lane.b32.xlu0 %v5837_v9, %s6242_s6 }
0x1630   :  { %3455 = vrot.lane.b32.xlu0 %v5839_v11, %s6243_s29 }
0x1634   :  { %3533 = vrot.lane.b32.xlu0 %v5837_v9, %s6243_s29 }
0x1638   :  { %3453 = vrot.lane.b32.xlu0 %v5839_v11, %s6244_s2 }
0x169f   :  { %v2716_v17 = vpop.xlane.xlu0 %2715 }
0x16a0   :  { %5302 = vrcp.f32 %v2716_v17 }
0x16a3   :  { %v2725_v18 = vpop.permute.xlu0 %2724 }
0x16a4   :  { %5001 = vmatpush3.msra.mxu0 %v2725_v18 }
0x16a5   :  { %5010 = vmatprep.subr.mxu0 %v4598_v31 }
0x16a7   :  { %v3295_v19 = vpop.permute.xlu0 %3294 }
0x16a8   :  { %5036 = vmatpush3.msra.mxu1 %v3295_v19 }
0x16a9   :  { %5045 = vmatprep.subr.mxu1 %v5410_v8 }
0x16aa   :  { %v5303_v20 = vpop.eup %5302 }
0x16ab   :  { %v2722_v21 = vmul.f32 %v5303_v20, %v5301_v15  ;;  %v3456_v49 = vpop.permute.xlu0 %3455 }
0x16ad   :  { %5003 = vmatmul.mubr.msk.f32.vlgmr.msra.gmra.mrb[20].mxu0 %vm170_vm2, %v2722_v21  ;;  %v2872_v22 = vpop.f32.mrb[34].mxu1 }
0x16ae   :  { %v5009_v23 = vpop.f32.mrb[35].mxu1  ;;  %5011 = vmatpush3.msra.mxu0 %v4598_v31  ;;  %v4634_v31 = vld [vmem:[%s6233_s27 + $0x1] ss:$0 sm:$0xff] }
0x16af   :  { %5015 = vmatprep.subr.mxu0 %v4597_v13  ;;  %v3534_v50 = vpop.permute.xlu0 %3533 }
0x16b1   :  { %v3112_v24 = vpop.f32.mrb[36].mxu1 }
0x16b2   :  { %v3194_v12 = vmul.f32 0.35355338, %v3112_v24  ;;  %v5024_v25 = vpop.f32.mrb[37].mxu1 }
0x16b3   :  { %v3454_v52 = vpop.permute.xlu0 %3453 }
0x16b4   :  { %v3196_v26 = vsel %vm170_vm2, %v3194_v12, -inf }
0x16b5   :  { %3197 = vmax.xlane.f32.xlu1 %v3196_v26  ;;  %v3190_v27 = vpop.f32.mrb[38].mxu1 }
0x16b6   :  { %v3195_v28 = vmul.f32 0.35355338, %v3190_v27  ;;  %v5029_v29 = vpop.f32.mrb[39].mxu1 }
0x16b8   :  { %v3199_v30 = vsel %vm170_vm2, %v3195_v28, -inf }
0x16b9   :  { %3200 = vmax.xlane.f32.xlu1 %v3199_v30 }
0x1742   :  { %v3198_v32 = vpop.xlane.xlu1 %3197 }
0x1743   :  { %v3202_v33 = vsub.f32 %v3194_v12, %v3198_v32  ;;  %v4600_v12 = vld [vmem:[%s6232_s3 + $0x38] sm:$0xff] }
0x1745   :  { %v3204_v34 = vmul.f32 1.442695, %v3202_v33 }
0x1746   :  { %v3201_v35 = vpop.xlane.xlu1 %3200 }
0x1747   :  { %5304 = vpow2.f32 %v3204_v34  ;;  %v3203_v36 = vsub.f32 %v3195_v28, %v3201_v35 }
0x1749   :  { %v3206_v37 = vmul.f32 1.442695, %v3203_v36 }
0x174b   :  { %5306 = vpow2.f32 %v3206_v37 }
0x1751   :  { %v5305_v38 = vpop.eup %5304 }
0x1752   :  { %v3208_v39 = vsel %vm170_vm2, %v5305_v38, 0.0 }
0x1753   :  { %3209 = vadd.xlane.f32.xlu1 %v3208_v39 }
0x1755   :  { %v5307_v40 = vpop.eup %5306 }
0x1756   :  { %v3211_v41 = vsel %vm170_vm2, %v5307_v40, 0.0 }
0x1757   :  { %3212 = vadd.xlane.f32.xlu1 %v3211_v41 }
0x1768   :  { %3218 = vrot.lane.b32.xlu1 %v5839_v11, %s6242_s6  ;;  %s5424_s6 = smov [#allocation2]  }
0x176c   :  { %3531 = vrot.lane.b32.xlu1 %v5837_v9, %s6244_s2 }
0x1780   :  { %v2796_v42 = vpop.f32.mrb[20].mxu0 }
0x1781   :  { %v5004_v43 = vpop.f32.mrb[21].mxu0  ;;  %5012 = vmatprep.mubr.msk.f32.mxu0 %vm170_vm2, %v2796_v42 }
0x1782   :  { %5013 = vmatmul.mubr.msk.f32.vlgmr.msra.gmra.mrb[22].mxu0 %vm170_vm2, %v2872_v22 }
0x1783   :  { %5017 = vmatprep.mubr.msk.f32.mxu0 %vm170_vm2, %v5902_v7  ;;  %5016 = vmatpush3.msra.mxu0 %v4597_v13 }
0x1784   :  { %5030 = vmatprep.subr.mxu0 %v5410_v8 }
0x178a   :  { %5018 = vmatmul.mubr.msk.f32.vlgmr.msra.gmra.mrb[22].mxu0 %vm170_vm2, %v5893_v44 }
0x178b   :  { %5032 = vmatprep.mubr.msk.f32.mxu0 %vm5411_vm1, %v5410_v8 }
0x17e0   :  { %v3210_v45 = vpop.xlane.xlu1 %3209 }
0x17e1   :  { %5308 = vrcp.f32 %v3210_v45 }
0x17e4   :  { %v3213_v46 = vpop.xlane.xlu1 %3212 }
0x17e5   :  { %5310 = vrcp.f32 %v3213_v46 }
0x17e8   :  { %v3219_v48 = vpop.permute.xlu1 %3218 }
0x17e9   :  { %5031 = vmatpush3.msra.mxu0 %v3219_v48 }
0x17ea   :  { %5040 = vmatprep.subr.mxu0 %v4599_v47 }
0x17eb   :  { %v5309_v7 = vpop.eup %5308 }
0x17ec   :  { %v3216_v5 = vmul.f32 %v5309_v7, %v5305_v38  ;;  %v3532_v57 = vpop.permute.xlu1 %3531 }
0x17ee   :  { %5033 = vmatmul.mubr.msk.f32.vlgmr.msra.gmra.mrb[24].mxu0 %vm170_vm2, %v3216_v5  ;;  %v4641_v5 = vld [vmem:[%s6181_s9 + $0x30] sm:$0xff] }
0x17ef   :  { %v5311_v44 = vpop.eup %5310  ;;  %5041 = vmatpush3.msra.mxu0 %v4599_v47 }
0x17f0   :  { %v3217_v51 = vmul.f32 %v5311_v44, %v5307_v40  ;;  %5050 = vmatprep.subr.mxu0 %v5410_v8  ;;  %v4642_v44 = vld [vmem:[%s6181_s9 + $0x38] sm:$0xff] }
0x17f2   :  { %5038 = vmatmul.mubr.msk.f32.vlgmr.msra.gmra.mrb[40].mxu1 %vm170_vm2, %v3217_v51  ;;  %v4647_v51 = vld [vmem:[%s6183_s11 + $0x40] sm:$0xff] }
0x17f3   :  { %5046 = vmatpush3.xpose.msk.msra.mxu1 %vm170_vm2, %v3456_v49  ;;  %5047 = vmatprep.mubr.msk.f32.mxu1 %vm5411_vm1, %v5410_v8  ;;  %v4640_v49 = vld [vmem:[%s6181_s9 + $0x28] sm:$0xff] }
0x17f4   :  { %5055 = vmatprep.subr.mxu1 %v5410_v8 }
0x17f6   :  { %5048 = vmatmul.mubr.msk.f32.vlgmr.msra.gmra.mrb[42].mxu1 %vm170_vm2, %v3454_v52  ;;  %v4648_v52 = vld [vmem:[%s6183_s11 + $0x48] sm:$0xff] }
0x17f7   :  { %5057 = vmatprep.mubr.msk.f32.mxu1 %vm5411_vm1, %v5410_v8 }
0x18c1   :  { %v3290_v53 = vpop.f32.mrb[24].mxu0 }
0x18c2   :  { %v5034_v54 = vpop.f32.mrb[25].mxu0  ;;  %5042 = vmatprep.mubr.msk.f32.mxu0 %vm170_vm2, %v3290_v53  ;;  %v4649_v53 = vld [vmem:[%s6183_s11 + $0x50] sm:$0xff] }
0x18c3   :  { %v5181_v54 = vpack.c.bf16 %v4648_v52, %v4647_v51  ;;  %v5423_v51 = vmov 0.0|0.0  }
0x18c5   :  { %v3366_v55 = vpop.f32.mrb[40].mxu1 }
0x18c6   :  { %v5039_v56 = vpop.f32.mrb[41].mxu1  ;;  %5043 = vmatmul.mubr.msk.f32.vlgmr.msra.gmra.mrb[22].mxu0 %vm170_vm2, %v3366_v55  ;;  %v4650_v55 = vld [vmem:[%s6183_s11 + $0x58] sm:$0xff] }
0x18c7   :  { %5051 = vmatpush3.xpose.msk.msra.mxu0 %vm170_vm2, %v3534_v50  ;;  %5052 = vmatprep.mubr.msk.f32.mxu0 %vm5411_vm1, %v5410_v8  ;;  %v5177_v50 = vpack.c.bf16 %v4642_v44, %v4641_v5  ;;  %v5185_v56 = vpack.c.bf16 %v4650_v55, %v4649_v53  ;;  %v4360_v5 = vld [vmem:[%s6189_s17 + $0x10] sm:$0xff]  ;;  %v4361_v44 = vld [vmem:[%s6189_s17 + $0x18] sm:$0xff] }
0x18c8   :  { %5060 = vmatprep.subr.mxu0 %v5410_v8  ;;  %v5213_v52 = vpack.c.bf16 %v4361_v44, %v4360_v5  ;;  %v4173_v53 = vld [vmem:[%s6185_s13 + $0x18] sm:$0xff] }
0x18c9   :  { %v3527_v58 = vpop.f32.mrb[42].mxu1 }
0x18ca   :  { %v3609_v59 = vmul.f32 0.35355338, %v3527_v58  ;;  %v5049_v60 = vpop.f32.mrb[43].mxu1  ;;  %5053 = vmatmul.mubr.msk.f32.vlgmr.msra.gmra.mrb[26].mxu0 %vm170_vm2, %v3532_v57  ;;  %v4651_v57 = vld [vmem:[%s6183_s11 + $0x60] sm:$0xff]  ;;  %v4652_v58 = vld [vmem:[%s6183_s11 + $0x68] sm:$0xff] }
0x18cb   :  { %5062 = vmatprep.mubr.msk.f32.mxu0 %vm5411_vm1, %v5410_v8 }
0x18cc   :  { %v3611_v61 = vsel %vm170_vm2, %v3609_v59, -inf }
0x18cd   :  { %3612 = vmax.xlane.f32.xlu0 %v3611_v61 }
0x195a   :  { %v3613_v62 = vpop.xlane.xlu0 %3612 }
0x195b   :  { %v3617_v63 = vsub.f32 %v3609_v59, %v3613_v62  ;;  %v5189_v59 = vpack.c.bf16 %v4652_v58, %v4651_v57 }
0x195d   :  { %v3619_v0 = vmul.f32 1.442695, %v3617_v63 }
0x195f   :  { %5312 = vpow2.f32 %v3619_v0 }
0x1969   :  { %v5313_v1 = vpop.eup %5312 }
0x196a   :  { %v3623_v4 = vsel %vm170_vm2, %v5313_v1, 0.0 }
0x196b   :  { %3624 = vadd.xlane.f32.xlu0 %v3623_v4 }
0x199d   :  { %v3605_v6 = vpop.f32.mrb[26].mxu0 }
0x199e   :  { %v3610_v10 = vmul.f32 0.35355338, %v3605_v6  ;;  %v5054_v14 = vpop.f32.mrb[27].mxu0  ;;  %v4637_v6 = vld [vmem:[%s6234_s26 + $0x1] ss:$0 sm:$0xff]  ;;  %s4501_s26 = sshll.u32 %s5424_s6, 4  ;;  %s4502_s26 = int_to_ptr.vmem [resolvable:$true] %s4501_s26 }
0x199f   :  { %s5340_s29 = scalar_lea.vmem %s4502_s26, 256  ;;  %p5345_p1 = scmp.lt.s32.totalorder %s4502_s26, %s4502_s26 }
0x19a0   :  { %v3614_v15 = vsel %vm170_vm2, %v3610_v10, -inf  ;;  %p5341_p0 = scmp.ne.s32.totalorder %s4502_s26, %s5340_s29  ;;  %p5346_p2 = scmp.lt.s32.totalorder %s5340_s29, %s5340_s29 }
0x19a1   :  { %3615 = vmax.xlane.f32.xlu1 %v3614_v15 }
0x19a2   :  { %p5347_p3 = por %p5346_p2, %p5345_p1 }
0x19a4   :  { %p5348_p4 = pnand %p5347_p3, %p5341_p0 }
0x19b2   :  { %3633 = vrot.lane.b32.xlu1 %v5839_v11, %s6245_s1 }
0x19f8   :  { %v3625_v16 = vpop.xlane.xlu0 %3624 }
0x19f9   :  { %5314 = vrcp.f32 %v3625_v16  ;;  %v4638_v16 = vld [vmem:[%s6235_s0 + $0x1] ss:$0 sm:$0xff] }
0x1a03   :  { %v5315_v18 = vpop.eup %5314 }
0x1a04   :  { %v3631_v21 = vmul.f32 %v5315_v18, %v5313_v1 }
0x1a2e   :  { %v3616_v17 = vpop.xlane.xlu1 %3615 }
0x1a2f   :  { %v3618_v19 = vsub.f32 %v3610_v10, %v3616_v17 }
0x1a31   :  { %v3621_v20 = vmul.f32 1.442695, %v3618_v19 }
0x1a32   :  { %v3634_v22 = vpop.permute.xlu1 %3633 }
0x1a33   :  { %5316 = vpow2.f32 %v3621_v20  ;;  %5056 = vmatpush3.msra.mxu1 %v3634_v22  ;;  %v4654_v22 = vld [vmem:[%s6183_s11 + $0x78] sm:$0xff] }
0x1a34   :  { %5058 = vmatmul.mubr.msk.f32.vlgmr.msra.gmra.mrb[44].mxu1 %vm170_vm2, %v3631_v21  ;;  %v4653_v21 = vld [vmem:[%s6183_s11 + $0x70] sm:$0xff] }
0x1a3d   :  { %v5317_v23 = vpop.eup %5316 }
0x1a3e   :  { %v3626_v24 = vsel %vm170_vm2, %v5317_v23, 0.0 }
0x1a3f   :  { %3627 = vadd.xlane.f32.xlu0 %v3626_v24  ;;  %v4644_v24 = vld [vmem:[%s6182_s10 + $0x1] ss:$0 sm:$0xff] }
0x1a55   :  { %3709 = vrot.lane.b32.xlu0 %v5837_v9, %s6245_s1 }
0x1acc   :  { %v3628_v11 = vpop.xlane.xlu0 %3627 }
0x1acd   :  { %5318 = vrcp.f32 %v3628_v11 }
0x1ad0   :  { %v3710_v25 = vpop.permute.xlu0 %3709 }
0x1ad1   :  { %5061 = vmatpush3.msra.mxu0 %v3710_v25 }
0x1ad2   :  { %5065 = vmatprep.subr.mxu0 %v4600_v12 }
0x1ad7   :  { %v5319_v26 = vpop.eup %5318 }
0x1ad8   :  { %v3632_v27 = vmul.f32 %v5319_v26, %v5317_v23  ;;  %v5193_v23 = vpack.c.bf16 %v4654_v22, %v4653_v21  ;;  %v4274_v21 = vld [vmem:[%s6187_s15 + $0x18] sm:$0xff] }
0x1ada   :  { %5063 = vmatmul.mubr.msk.f32.vlgmr.msra.gmra.mrb[28].mxu0 %vm170_vm2, %v3632_v27 }
0x1adb   :  { %5066 = vmatpush3.msra.mxu0 %v4600_v12 }
0x1adc   :  { %5182 = vmatprep.subr.bf16.mxu0 %v5181_v54 }
0x1b07   :  { %v3705_v28 = vpop.f32.mrb[44].mxu1 }
0x1b08   :  { %v5059_v29 = vpop.f32.mrb[45].mxu1  ;;  %5067 = vmatprep.mubr.msk.f32.mxu0 %vm170_vm2, %v3705_v28 }
0x1b09   :  { %v4656_v29 = vld [vmem:[%s6184_s12 + $0x1] ss:$0 sm:$0xff] }
0x1bad   :  { %v3781_v30 = vpop.f32.mrb[28].mxu0 }
0x1bae   :  { %v5064_v9 = vpop.f32.mrb[29].mxu0  ;;  %5068 = vmatmul.mubr.msk.f32.vlgmr.msra.gmra.mrb[22].mxu0 %vm170_vm2, %v3781_v30 }
0x1baf   :  { %5184 = vmatpush3.bf16.msra.mxu0 %v5181_v54 }
0x1bb0   :  { %5186 = vmatprep.subr.bf16.mxu0 %v5185_v56 }
0x1bb3   :  { %5188 = vmatpush3.bf16.msra.mxu0 %v5185_v56 }
0x1bb4   :  { %5190 = vmatprep.subr.bf16.mxu0 %v5189_v59 }
0x1bb7   :  { %5192 = vmatpush3.bf16.msra.mxu0 %v5189_v59 }
0x1bb8   :  { %5194 = vmatprep.subr.bf16.mxu0 %v5193_v23 }
0x1bbb   :  { %5196 = vmatpush3.bf16.msra.mxu0 %v5193_v23 }
0x1c81   :  { %v5069_v13 = vpop.f32.mrb[22].mxu0 }
0x1c82   :  { %v3877_v32 = vadd.f32 %v5069_v13, %v4634_v31  ;;  %v3857_v33 = vpop.f32.mrb[23].mxu0 }
0x1c83   :  { %v3876_v34 = vadd.f32 %v4634_v31, %v3857_v33 }
0x1c84   :  { %v3879_v35 = vadd.f32 %v3877_v32, %v5826_v3 }
0x1c85   :  { %v3878_v36 = vadd.f32 %v3876_v34, %v5824_v2  ;;  %v4639_v2 = vld [vmem:[%s6181_s9 + $0x20] sm:$0xff] }
0x1c86   :  { %v3887_v37 = vsel %vm81_vm0, %v3879_v35, 0.0  ;;  %v5173_v7 = vpack.c.bf16 %v4640_v49, %v4639_v2  ;;  %v4170_v2 = vld [vmem:[%s6185_s13] sm:$0xff]  ;;  %v4171_v49 = vld [vmem:[%s6185_s13 + $0x8] sm:$0xff] }
0x1c87   :  { %3888 = vadd.xlane.f32.xlu0 %v3887_v37  ;;  %v3884_v38 = vsel %vm81_vm0, %v3878_v36, 0.0 }
0x1c88   :  { %3885 = vadd.xlane.f32.xlu1 %v3884_v38  ;;  %5174 = vmatprep.subr.bf16.mxu1 %v5173_v7 }
0x1c89   :  { %5176 = vmatpush3.bf16.msra.mxu1 %v5173_v7  ;;  %v5198_v7 = vpack.c.bf16 %v4171_v49, %v4170_v2 }
0x1c8a   :  { %5178 = vmatprep.subr.bf16.mxu1 %v5177_v50 }
0x1c8d   :  { %5180 = vmatpush3.bf16.msra.mxu1 %v5177_v50  ;;  %v4172_v50 = vld [vmem:[%s6185_s13 + $0x10] sm:$0xff] }
0x1c8e   :  { %5197 = vmatprep.subr.bf16.mxu1 %v5423_v51  ;;  %v5201_v54 = vpack.c.bf16 %v4173_v53, %v4172_v50 }
0x1d14   :  { %v3889_v39 = vpop.xlane.xlu0 %3888 }
0x1d15   :  { %v3891_v40 = vmul.f32 0.03125, %v3889_v39  ;;  %v3886_v41 = vpop.xlane.xlu1 %3885 }
0x1d16   :  { %v3890_v42 = vmul.f32 0.03125, %v3886_v41 }
0x1d17   :  { %v3893_v43 = vsub.f32 %v3879_v35, %v3891_v40 }
0x1d18   :  { %v3892_v45 = vsub.f32 %v3878_v36, %v3890_v42 }
0x1d19   :  { %v3895_v46 = vmul.f32 %v3893_v43, %v3893_v43 }
0x1d1a   :  { %v3894_v47 = vmul.f32 %v3892_v45, %v3892_v45 }
0x1d1b   :  { %v3899_v48 = vsel %vm81_vm0, %v3895_v46, 0.0 }
0x1d1c   :  { %3900 = vadd.xlane.f32.xlu0 %v3899_v48  ;;  %v3896_v3 = vsel %vm81_vm0, %v3894_v47, 0.0  ;;  %v4358_v47 = vld [vmem:[%s6189_s17] sm:$0xff]  ;;  %v4359_v48 = vld [vmem:[%s6189_s17 + $0x8] sm:$0xff] }
0x1d1d   :  { %3897 = vadd.xlane.f32.xlu1 %v3896_v3  ;;  %v5209_v3 = vpack.c.bf16 %v4359_v48, %v4358_v47 }
0x1d1f   :  { %5210 = vmatprep.subr.bf16.mxu0 %v5209_v3 }
0x1da9   :  { %v3901_v60 = vpop.xlane.xlu0 %3900 }
0x1daa   :  { %v3903_v61 = vmul.f32 0.03125, %v3901_v60  ;;  %v3898_v62 = vpop.xlane.xlu1 %3897 }
0x1dab   :  { %v3902_v63 = vmul.f32 0.03125, %v3898_v62  ;;  %v4661_v62 = vld [vmem:[%s6179_s7 + $0x1] ss:$0 sm:$0xff] }
0x1dac   :  { %v3905_v0 = vadd.f32 1e-05, %v3903_v61 }
0x1dad   :  { %v3904_v1 = vadd.f32 1e-05, %v3902_v63 }
0x1dae   :  { %5320 = vrsqrt.f32 %v3905_v0 }
0x1daf   :  { %5322 = vrsqrt.f32 %v3904_v1  ;;  %v4662_v1 = vld [vmem:[%s6180_s8 + $0x1] ss:$0 sm:$0xff] }
0x1db8   :  { %v5321_v4 = vpop.eup %5320 }
0x1db9   :  { %v5323_v10 = vpop.eup %5322  ;;  %v3909_v14 = vmul.f32 %v5321_v4, %v3893_v43 }
0x1dba   :  { %v3908_v15 = vmul.f32 %v5323_v10, %v3892_v45 }
0x1dbb   :  { %v3917_v17 = vmul.f32 %v4637_v6, %v3909_v14  ;;  %v4271_v14 = vld [vmem:[%s6187_s15] sm:$0xff] }
0x1dbc   :  { %v3916_v18 = vmul.f32 %v4637_v6, %v3908_v15  ;;  %v4272_v15 = vld [vmem:[%s6187_s15 + $0x8] sm:$0xff] }
0x1dbd   :  { %v3925_v20 = vadd.f32 %v4638_v16, %v3917_v17 }
0x1dbe   :  { %v3924_v19 = vadd.f32 %v4638_v16, %v3916_v18 }
0x1dc0   :  { %5078 = vmatprep.mubr.msk.f32.mxu1 %vm81_vm0, %v3924_v19 }
0x1dc1   :  { %5079 = vmatmul.mubr.msk.f32.vlgmr.msra.gmra.mrb[46].mxu1 %vm81_vm0, %v3925_v20 }
0x1dc2   :  { %5108 = vmatprep.mubr.msk.f32.mxu1 %vm5411_vm1, %v5410_v8  ;;  %5199 = vmatpush3.bf16.msra.mxu1 %v5198_v7 }
0x1dc3   :  { %5200 = vmatprep.subr.bf16.mxu1 %v5423_v51 }
0x1dc6   :  { %5202 = vmatpush3.bf16.msra.mxu1 %v5201_v54 }
0x1dc7   :  { %5203 = vmatprep.subr.bf16.mxu1 %v5423_v51 }
0x1e94   :  { %v5080_v11 = vpop.f32.mrb[46].mxu1 }
0x1e95   :  { %v4017_v12 = vadd.f32 %v5080_v11, %v4644_v24  ;;  %v4011_v25 = vpop.f32.mrb[47].mxu1 }
0x1e96   :  { %v4012_v26 = vadd.f32 %v4644_v24, %v4011_v25  ;;  %v4663_v25 = vld [vmem:[%s6186_s14] ss:$0 sm:$0xff] }
0x1e97   :  { %v4021_v28 = vmax.f32 %v4017_v12, 0.0  ;;  %v4667_v12 = vld [vmem:[%s6190_s18] ss:$0 sm:$0xff] }
0x1e98   :  { %v4020_v27 = vmax.f32 %v4012_v26, 0.0 }
0x1e9a   :  { %5097 = vmatprep.mubr.msk.f32.mxu0 %vm1987_vm3, %v4020_v27 }
0x1e9b   :  { %5098 = vmatmul.mubr.msk.f32.vlgmr.msra.gmra.mrb[30].mxu0 %vm1987_vm3, %v4021_v28 }
0x1e9c   :  { %5212 = vmatpush3.bf16.msra.mxu0 %v5209_v3 }
0x1e9d   :  { %5214 = vmatprep.subr.bf16.mxu0 %v5213_v52 }
0x1ea0   :  { %5216 = vmatpush3.bf16.msra.mxu0 %v5213_v52 }
0x1f6e   :  { %v5099_v30 = vpop.f32.mrb[30].mxu0 }
0x1f6f   :  { %v4117_v9 = vadd.f32 %v5099_v30, %v4656_v29  ;;  %v4111_v31 = vpop.f32.mrb[31].mxu0 }
0x1f70   :  { %v4112_v13 = vadd.f32 %v4656_v29, %v4111_v31 }
0x1f71   :  { %v4121_v32 = vadd.f32 %v4117_v9, %v3925_v20  ;;  %v4273_v20 = vld [vmem:[%s6187_s15 + $0x10] sm:$0xff] }
0x1f72   :  { %v4120_v33 = vadd.f32 %v4112_v13, %v3924_v19  ;;  %v5204_v19 = vpack.c.bf16 %v4272_v15, %v4271_v14  ;;  %v5207_v23 = vpack.c.bf16 %v4274_v21, %v4273_v20 }
0x1f73   :  { %v4129_v34 = vsel %vm81_vm0, %v4121_v32, 0.0 }
0x1f74   :  { %4130 = vadd.xlane.f32.xlu1 %v4129_v34  ;;  %v4126_v35 = vsel %vm81_vm0, %v4120_v33, 0.0 }
0x1f75   :  { %4127 = vadd.xlane.f32.xlu0 %v4126_v35 }
0x2001   :  { %v4131_v36 = vpop.xlane.xlu1 %4130 }
0x2002   :  { %v4133_v37 = vmul.f32 0.03125, %v4131_v36  ;;  %v4128_v38 = vpop.xlane.xlu0 %4127 }
0x2003   :  { %v4132_v39 = vmul.f32 0.03125, %v4128_v38 }
0x2004   :  { %v4135_v40 = vsub.f32 %v4121_v32, %v4133_v37  ;;  %v4665_v37 = vld [vmem:[%s6188_s16] ss:$0 sm:$0xff] }
0x2005   :  { %v4134_v41 = vsub.f32 %v4120_v33, %v4132_v39 }
0x2006   :  { %v4137_v42 = vmul.f32 %v4135_v40, %v4135_v40 }
0x2007   :  { %v4136_v43 = vmul.f32 %v4134_v41, %v4134_v41 }
0x2008   :  { %v4141_v45 = vsel %vm81_vm0, %v4137_v42, 0.0 }
0x2009   :  { %4142 = vadd.xlane.f32.xlu1 %v4141_v45  ;;  %v4138_v46 = vsel %vm81_vm0, %v4136_v43, 0.0 }
0x200a   :  { %4139 = vadd.xlane.f32.xlu0 %v4138_v46 }
0x2096   :  { %v4143_v55 = vpop.xlane.xlu1 %4142 }
0x2097   :  { %v4145_v56 = vmul.f32 0.03125, %v4143_v55  ;;  %v4140_v57 = vpop.xlane.xlu0 %4139 }
0x2098   :  { %v4144_v58 = vmul.f32 0.03125, %v4140_v57 }
0x2099   :  { %v4147_v59 = vadd.f32 1e-05, %v4145_v56 }
0x209a   :  { %v4146_v60 = vadd.f32 1e-05, %v4144_v58 }
0x209b   :  { %5324 = vrsqrt.f32 %v4147_v59 }
0x209c   :  { %5326 = vrsqrt.f32 %v4146_v60 }
0x20a5   :  { %v5325_v61 = vpop.eup %5324 }
0x20a6   :  { %v5327_v63 = vpop.eup %5326  ;;  %v4151_v0 = vmul.f32 %v5325_v61, %v4135_v40 }
0x20a7   :  { %v4150_v4 = vmul.f32 %v5327_v63, %v4134_v41 }
0x20a8   :  { %v4159_v6 = vmul.f32 %v4661_v62, %v4151_v0 }
0x20a9   :  { %v4158_v10 = vmul.f32 %v4661_v62, %v4150_v4 }
0x20aa   :  { %v4167_v16 = vadd.f32 %v4662_v1, %v4159_v6 }
0x20ab   :  { %v4166_v17 = vadd.f32 %v4662_v1, %v4158_v10 }
0x20ac   :  { %4169 = vst.msk [vmem:[#allocation2 + $0x8] sm:$0xff] %vm81_vm0, %v4167_v16  ;;  %v4183_v18 = vrot.slane %v4167_v16, 7 }
0x20ad   :  { %5130 = vmatprep.mubr.msk.f32.mxu0 %vm81_vm0, %v4166_v17  ;;  %4168 = vst.msk [vmem:[#allocation2] sm:$0xff] %vm81_vm0, %v4166_v17  ;;  %v4282_v24 = vrot.slane %v4166_v17, 1 }
0x20ae   :  { %5131 = vmatmul.mubr.msk.f32.vlgmr.msra.gmra.mrb[32].mxu0 %vm81_vm0, %v4167_v16  ;;  %v4185_v22 = vsel %vm4184_vm4, %v4183_v18, %v4166_v17 }
0x20af   :  { %5109 = vmatmul.mubr.msk.f32.vlgmr.msra.gmra.mrb[48].mxu1 %vm81_vm0, %v4185_v22  ;;  %v4283_v11 = vsel %vm4184_vm4, %v4167_v16, %v4282_v24 }
0x20b0   :  { %5205 = vmatpush3.bf16.msra.mxu1 %v5204_v19  ;;  %5119 = vmatprep.mubr.msk.f32.mxu1 %vm5411_vm1, %v5410_v8 }
0x20b1   :  { %5206 = vmatprep.subr.bf16.mxu1 %v5423_v51 }
0x20b4   :  { %5208 = vmatpush3.bf16.msra.mxu1 %v5207_v23 }
0x20b7   :  { %5120 = vmatmul.mubr.msk.f32.vlgmr.msra.gmra.mrb[50].mxu1 %vm81_vm0, %v4283_v11 }
0x2181   :  { %v5132_v26 = vpop.f32.mrb[32].mxu0 }
0x2182   :  { %v4445_v27 = vadd.f32 %v5132_v26, %v4667_v12  ;;  %v4254_v28 = vpop.f32.mrb[48].mxu1  ;;  %v4439_v8 = vpop.f32.mrb[33].mxu0 }
0x2183   :  { %v4255_v29 = vadd.f32 %v4663_v25, %v4254_v28  ;;  %v4440_v30 = vadd.f32 %v4667_v12, %v4439_v8  ;;  %v5110_v9 = vpop.f32.mrb[49].mxu1 }
0x2184   :  { %v4456_v31 = vsel %vm4448_vm5, %v4445_v27, -inf }
0x2185   :  { %v4457_v13 = vrot.slane %v4456_v31, 4  ;;  %v4449_v32 = vsel %vm4448_vm5, %v4440_v30, -inf  ;;  %v4259_v33 = vsel %vm4258_vm6, %v4255_v29, -inf }
0x2186   :  { %v4450_v34 = vrot.slane %v4449_v32, 4  ;;  %4260 = vmax.xlane.f32.xlu1 %v4259_v33 }
0x2187   :  { %v4458_v35 = vmax.f32 %v4456_v31, %v4457_v13 }
0x2188   :  { %v4451_v36 = vmax.f32 %v4449_v32, %v4450_v34 }
0x2189   :  { %v4459_v38 = vrot.slane %v4458_v35, 2 }
0x218a   :  { %v4452_v39 = vrot.slane %v4451_v36, 2  ;;  %v4352_v40 = vpop.f32.mrb[50].mxu1 }
0x218b   :  { %v4460_v41 = vmax.f32 %v4458_v35, %v4459_v38  ;;  %v4353_v42 = vadd.f32 %v4665_v37, %v4352_v40  ;;  %v5121_v43 = vpop.f32.mrb[51].mxu1 }
0x218c   :  { %v4453_v45 = vmax.f32 %v4451_v36, %v4452_v39 }
0x218d   :  { %v4461_v46 = vrot.slane %v4460_v41, 1  ;;  %4357 = vst.msk [vmem:[#allocation6] sm:$0x3] %vm4356_vm7, %v4353_v42 }
0x218e   :  { %v4454_v47 = vrot.slane %v4453_v45, 1 }
0x218f   :  { %v4462_v48 = vmax.f32 %v4460_v41, %v4461_v46 }
0x2190   :  { %v4455_v3 = vmax.f32 %v4453_v45, %v4454_v47 }
0x2191   :  { %v4464_v2 = vsub.f32 %v4445_v27, %v4462_v48 }
0x2192   :  { %v4463_v49 = vsub.f32 %v4440_v30, %v4455_v3 }
0x2193   :  { %v4467_v7 = vmul.f32 1.442695, %v4464_v2 }
0x2194   :  { %v4465_v5 = vmul.f32 1.442695, %v4463_v49 }
0x2195   :  { %5328 = vpow2.f32 %v4467_v7 }
0x2196   :  { %5330 = vpow2.f32 %v4465_v5 }
0x219f   :  { %v5329_v44 = vpop.eup %5328 }
0x21a0   :  { %v5331_v50 = vpop.eup %5330  ;;  %v4472_v51 = vrot.slane %v5329_v44, 2 }
0x21a1   :  { %v4471_v52 = vrot.slane %v5331_v50, 2 }
0x21a2   :  { %v4483_v53 = vsel %vm4475_vm8, %v4472_v51, 0.0 }
0x21a3   :  { %v4484_v54 = vrot.slane %v4483_v53, 4  ;;  %v4476_v55 = vsel %vm4475_vm8, %v4471_v52, 0.0 }
0x21a4   :  { %v4477_v56 = vrot.slane %v4476_v55, 4 }
0x21a5   :  { %v4485_v57 = vadd.f32 %v4484_v54, %v4483_v53 }
0x21a6   :  { %v4478_v58 = vadd.f32 %v4477_v56, %v4476_v55 }
0x21a7   :  { %v4486_v59 = vrot.slane %v4485_v57, 2 }
0x21a8   :  { %v4479_v60 = vrot.slane %v4478_v58, 2 }
0x21a9   :  { %v4487_v61 = vadd.f32 %v4486_v59, %v4485_v57 }
0x21aa   :  { %v4480_v62 = vadd.f32 %v4479_v60, %v4478_v58 }
0x21ab   :  { %v4488_v63 = vrot.slane %v4487_v61, 1 }
0x21ac   :  { %v4481_v0 = vrot.slane %v4480_v62, 1 }
0x21ad   :  { %v4489_v1 = vadd.f32 %v4488_v63, %v4487_v61 }
0x21ae   :  { %v4482_v4 = vadd.f32 %v4481_v0, %v4480_v62 }
0x21af   :  { %5332 = vrcp.f32 %v4489_v1 }
0x21b0   :  { %5334 = vrcp.f32 %v4482_v4 }
0x21b9   :  { %v5333_v6 = vpop.eup %5332 }
0x21ba   :  { %v5335_v10 = vpop.eup %5334  ;;  %v4493_v14 = vmul.f32 %v5333_v6, %v5329_v44 }
0x21bb   :  { %v4492_v15 = vmul.f32 %v5335_v10, %v5331_v50 }
0x21bc   :  { %4495 = vst.msk [vmem:[%s6194_s22 + $0x6] sm:$0xfc] %vm4448_vm5, %v4493_v14 }
0x21bd   :  { %4494 = vst.msk [vmem:[%s6194_s22 - $0x2] sm:$0xfc] %vm4448_vm5, %v4492_v15 }
0x2213   :  { %v4261_v16 = vpop.xlane.xlu1 %4260 }
0x2214   :  { %v4262_v17 = vsub.f32 %v4255_v29, %v4261_v16 }
0x2216   :  { %v4263_v18 = vmul.f32 1.442695, %v4262_v17 }
0x2218   :  { %5336 = vpow2.f32 %v4263_v18 }
0x2222   :  { %v5337_v19 = vpop.eup %5336 }
0x2223   :  { %v4265_v20 = vsel %vm4258_vm6, %v5337_v19, 0.0 }
0x2224   :  { %4266 = vadd.xlane.f32.xlu0 %v4265_v20 }
0x2225   :  { %5351 = shalt.err (!%p5348_p4)
}
0x2226   :  { %s5352_s0 = scalar_lea.hbm %s6191_s19, 256 }
0x2227   :  { %p5353_p5 = scmp.ne.s32.totalorder %s6191_s19, %s5352_s0  ;;  %p5356_p6 = scmp.lt.u32.totalorder %s5352_s0, %s6191_s19 }
0x2229   :  { %p5358_p7 = pnand %p5356_p6, %p5353_p5 }
0x222b   :  { %5361 = shalt.err (!%p5358_p7)
}
0x222c   :  { %s5425_s9 = smov 128   ;;  %s5426_s10 = smov 8  }
0x222d   :  { %4507 = dma.vmem_to_hbm [thread:$0]  %s4502_s26, 256, %s6191_s19, [#allocation3], %s5425_s9, %s5425_s9, %s5426_s10  }
0x222e   :  { %s5427_s7 = smov [#allocation4]   ;;  %s5428_s5 = smov [#allocation6]  }
0x222f   :  { %s4514_s8 = sshll.u32 %s5427_s7, 4  ;;  %s4524_s4 = sshll.u32 %s5428_s5, 4  ;;  %s4515_s8 = int_to_ptr.vmem [resolvable:$true] %s4514_s8  ;;  %s4525_s4 = int_to_ptr.vmem [resolvable:$true] %s4524_s4 }
0x2230   :  { %s5362_s28 = scalar_lea.vmem %s4515_s8, 32  ;;  %p5367_p9 = scmp.lt.s32.totalorder %s4515_s8, %s4515_s8 }
0x2231   :  { %p5363_p8 = scmp.ne.s32.totalorder %s4515_s8, %s5362_s28  ;;  %p5368_p10 = scmp.lt.s32.totalorder %s5362_s28, %s5362_s28 }
0x2233   :  { %p5369_p11 = por %p5368_p10, %p5367_p9 }
0x2235   :  { %p5370_p12 = pnand %p5369_p11, %p5363_p8 }
0x22b1   :  { %v4267_v21 = vpop.xlane.xlu0 %4266 }
0x22b2   :  { %5338 = vrcp.f32 %v4267_v21 }
0x22bc   :  { %v5339_v22 = vpop.eup %5338 }
0x22bd   :  { %v4269_v23 = vmul.f32 %v5339_v22, %v5337_v19 }
0x22bf   :  { %4270 = vst.msk [vmem:[#allocation4] sm:$0x3] %vm4258_vm6, %v4269_v23 }
0x22c0   :  { %5373 = shalt.err (!%p5370_p12)
}
0x22c1   :  { %s5374_s30 = scalar_lea.hbm %s6192_s20, 32 }
0x22c2   :  { %p5375_p13 = scmp.ne.s32.totalorder %s6192_s20, %s5374_s30  ;;  %p5378_p0 = scmp.lt.u32.totalorder %s5374_s30, %s6192_s20 }
0x22c4   :  { %p5380_p1 = pnand %p5378_p0, %p5375_p13 }
0x22c6   :  { %5383 = shalt.err (!%p5380_p1)
}
0x22c7   :  { %4517 = dma.vmem_to_hbm [thread:$0]  %s4515_s8, 32, %s6192_s20, [#allocation5]  }
0x22c8   :  { %s5384_s24 = scalar_lea.vmem %s4525_s4, 32  ;;  %p5389_p3 = scmp.lt.s32.totalorder %s4525_s4, %s4525_s4 }
0x22c9   :  { %p5385_p2 = scmp.ne.s32.totalorder %s4525_s4, %s5384_s24  ;;  %p5390_p4 = scmp.lt.s32.totalorder %s5384_s24, %s5384_s24 }
0x22cb   :  { %p5391_p5 = por %p5390_p4, %p5389_p3 }
0x22cd   :  { %p5392_p6 = pnand %p5391_p5, %p5385_p2 }
0x22cf   :  { %5395 = shalt.err (!%p5392_p6)
}
0x22d0   :  { %s5396_s29 = scalar_lea.hbm %s6193_s21, 32 }
0x22d1   :  { %p5397_p7 = scmp.ne.s32.totalorder %s6193_s21, %s5396_s29  ;;  %p5400_p8 = scmp.lt.u32.totalorder %s5396_s29, %s6193_s21 }
0x22d3   :  { %p5402_p9 = pnand %p5400_p8, %p5397_p7 }
0x22d5   :  { %5405 = shalt.err (!%p5402_p9)
}
0x22d6   :  { %4527 = dma.vmem_to_hbm [thread:$0]  %s4525_s4, 32, %s6193_s21, [#allocation5]  }
0x22d7   :  { %5406 = dma.done.wait [#allocation3], 256  }
0x22d8   :  { %5407 = vsyncadd [#allocation3], 4294967040 }
0x22d9   :  { %5408 = dma.done.wait [#allocation5], 64  }
0x22da   :  { %5409 = vsyncadd [#allocation5], 4294967232 }
0x22db   :  { %4541 = vsyncpa [#allocation3], 1 }
0x22dc   :  { %4542 = vsyncpa [#allocation5], 1 }

</bundles_post_ra>
